<compile_context>
chip_gen: v7x
topology: tpu7x:2x2x1
jax: 0.10.0
libtpu: 0.0.40
codegen_flags: <defaults>
</compile_context>

<pallas_src>
from math import sqrt

import jax
import jax.numpy as jnp
from jax import lax
from jax.experimental import pallas as pl
from jax.experimental.pallas import tpu as pltpu


def _make_kernel(bt, C, OC, F, T, K, KKC_pad):
    P = K // 2
    FT = F * T
    R = bt * C           # activation rows per grid step
    W = bt * FT          # wide lane width for the batched conv matmul
    LOG2F = F.bit_length() - 1
    KKC = K * K * C

    def kernel(x_ref, mask_ref, g1_ref, bl1_ref, w1_ref, bc1_ref,
               g2_ref, bl2_ref, w2_ref, bc2_ref, o_ref):

        def fsum(v):
            # Sum over the F feature groups of each FT-lane row with a
            # log2(F)-step lane roll-reduce.  Rolls by multiples of T wrap the
            # feature index cyclically (row is exactly F*T lanes), so every
            # lane ends up holding the full F-sum (broadcast comes free).
            for k in range(LOG2F):
                v = v + pltpu.roll(v, shift=(1 << k) * T, axis=1)
            return v

        def layer_norm(h, g_ref, b_ref):
            # h: (R, FT) f32.  Mean + CENTERED variance entirely in f32.
            mean = fsum(h) * (1.0 / F)
            hc = h - mean
            var = fsum(hc * hc) * (1.0 / F)
            return hc * lax.rsqrt(var + 1e-5) * g_ref[...] + b_ref[...]

        def gelu(x):
            # tanh-approximate GELU: tanh runs on the EUP slot (VALU stays
            # free).  Reference / PyTorch default is exact erf (documented).
            c = 0.7978845608028654                              # sqrt(2/pi)
            return 0.5 * x * (1.0 + jnp.tanh(c * (x + 0.044715 * (x * x * x))))

        def conv_same(h, w_ref, b_ref):
            # h: (R, FT) f32.  One (OC, KKC_pad) @ (KKC_pad, bt*FT) matmul:
            # all bt samples share a single MXU pass by living side by side
            # along lanes.  The rearrangement uses only vreg-aligned lane
            # slices / concats (FT = 256 = 2 vregs).
            if bt == 1:
                hw = h
            else:
                hw = jnp.concatenate(
                    [h[b * C:(b + 1) * C, :] for b in range(bt)], axis=1)
            cols = []
            for df in range(K):                  # tap over n_feats
                for dt in range(K):              # tap over time
                    s = (df - P) * T + (dt - P)  # flat lane shift
                    if s == 0:
                        shifted = hw
                    else:
                        # XLU lane rotate; any cross-sample / cross-row wrap
                        # lands only on lanes the mask zeroes anyway.
                        shifted = pltpu.roll(hw, shift=(-s) % W, axis=1)
                    tap = df * K + dt
                    cols.append(shifted * mask_ref[tap:tap + 1, :])
            if KKC_pad > KKC:                    # pad contraction 72 -> 80
                cols.append(jnp.zeros((KKC_pad - KKC, W), jnp.float32))
            # (KKC_pad, W) f32 concat (sublane-aligned), single cast to bf16.
            xcol = jnp.concatenate(cols, axis=0).astype(jnp.bfloat16)
            y = jnp.dot(w_ref[...], xcol, preferred_element_type=jnp.float32)
            y = y + b_ref[...]                   # (OC, 1) broadcast, once
            if bt == 1:
                return y
            # (OC, bt*FT) -> (bt*OC, FT): lane slices at FT multiples.
            return jnp.concatenate(
                [y[:, b * FT:(b + 1) * FT] for b in range(bt)], axis=0)

        x = x_ref[...].reshape(R, FT)            # free merge of (bt, C)
        residual = x
        h = layer_norm(x, g1_ref, bl1_ref)
        h = gelu(h)
        # dropout1: identity at inference
        h = conv_same(h, w1_ref, bc1_ref)
        h = layer_norm(h, g2_ref, bl2_ref)
        h = gelu(h)
        # dropout2: identity at inference
        h = conv_same(h, w2_ref, bc2_ref)
        o_ref[...] = (h + residual).reshape(bt, C, FT).astype(o_ref.dtype)

    return kernel


def _choose_bt(B, C):
    """Batch-tile policy: target bt*C ~ 64-128 rows per grid step.

    Prefer exactly two grid steps only when each step still carries >= 64
    rows (keeps both v7x TensorCores busy); otherwise take the largest
    divisor of B with bt*C <= 128 (one fat step on v5e/v6e at small B --
    removes per-step pipeline overhead and fills MXU rows).
    """
    divisors = [d for d in range(1, B + 1) if B % d == 0]
    for d in reversed(divisors):
        if B // d == 2 and 64 <= d * C <= 128:
            return d
    for d in reversed(divisors):
        if d * C <= 128:
            return d
    return 1


def residual_cnn_forward(x_nchw, params, *, kernel_size, stride=1):
    """x_nchw: (B, C, n_feats, T) float32, matching the PyTorch module."""
    assert stride == 1, "residual add requires stride == 1"
    B, C, F, T = x_nchw.shape
    OC = params["w1"].shape[0]
    assert OC == C, "residual add requires in_channels == out_channels"
    # TODO(synk): generic-F LayerNorm reduce (e.g. small (FT,T)/(T,FT) matmul
    # pair) for non-power-of-two n_feats; the roll-reduce needs power-of-two F.
    assert F & (F - 1) == 0, "n_feats must be a power of two for roll-reduce"
    K = kernel_size
    P = K // 2
    FT = F * T

    bt = _choose_bt(B, C)
    W = bt * FT

    # im2col contraction dim padded to a multiple of 16 so the bf16 xcol block
    # is a whole number of (16, 128) tiles (zero rows/cols; MXU pads anyway).
    KKC = K * K * C
    KKC_pad = ((KKC + 15) // 16) * 16

    # Free reshape (row-major collapse) -- no transpose, no HBM round trip.
    x2 = x_nchw.reshape(B, C, FT).astype(jnp.float32)

    # Per-tap validity masks for the "same" zero padding, tiled per sample
    # along the bt*FT-wide lanes: (K*K, bt*FT).
    f_idx = jnp.arange(F)[:, None]
    t_idx = jnp.arange(T)[None, :]
    mrows = []
    for df in range(K):
        for dt in range(K):
            okf = (f_idx + df - P >= 0) & (f_idx + df - P < F)
            okt = (t_idx + dt - P >= 0) & (t_idx + dt - P < T)
            mrows.append((okf & okt).astype(jnp.float32).reshape(FT))
    mask = jnp.tile(jnp.stack(mrows), (1, bt))

    def lane_vec(v):      # per-feature (F,) -> per-lane (1, FT), lane = f*T + t
        return jnp.repeat(v.astype(jnp.float32), T).reshape(1, FT)

    def im2col_w(w):      # (OC, IC, kH, kW) -> (OC, KKC_pad) bf16, tap-major
        wi = jnp.transpose(w, (0, 2, 3, 1)).reshape(
            w.shape[0], K * K * w.shape[1])
        wi = jnp.pad(wi, ((0, 0), (0, KKC_pad - wi.shape[1])))
        return wi.astype(jnp.bfloat16)

    g1 = lane_vec(params["ln1_w"]); bl1 = lane_vec(params["ln1_b"])
    g2 = lane_vec(params["ln2_w"]); bl2 = lane_vec(params["ln2_b"])
    w1 = im2col_w(params["w1"]); w2 = im2col_w(params["w2"])
    bc1 = params["b1"].reshape(OC, 1).astype(jnp.float32)
    bc2 = params["b2"].reshape(OC, 1).astype(jnp.float32)

    kernel = _make_kernel(bt, C, OC, F, T, K, KKC_pad)

    def const(shape):
        n = len(shape)
        return pl.BlockSpec(shape, lambda i, _n=n: (0,) * _n)

    out = pl.pallas_call(
        kernel,
        out_shape=jax.ShapeDtypeStruct((B, C, FT), jnp.float32),
        grid_spec=pltpu.PrefetchScalarGridSpec(
            num_scalar_prefetch=0,
            grid=(B // bt,),
            in_specs=[
                pl.BlockSpec((bt, C, FT), lambda i: (i, 0, 0)),
                const((K * K, W)),                 # tap masks (per-sample tiled)
                const((1, FT)), const((1, FT)),    # LN1 gamma / beta
                const((OC, KKC_pad)), const((OC, 1)),   # conv1 W / b
                const((1, FT)), const((1, FT)),    # LN2 gamma / beta
                const((OC, KKC_pad)), const((OC, 1)),   # conv2 W / b
            ],
            out_specs=pl.BlockSpec((bt, C, FT), lambda i: (i, 0, 0)),
        ),
        compiler_params=pltpu.CompilerParams(
            dimension_semantics=("parallel",)),
    )(x2, mask, g1, bl1, w1, bc1, g2, bl2, w2, bc2)

    return out.reshape(B, C, F, T)   # free reshape back to NCHW


# ---------------- pure-JAX reference (NCHW, same as PyTorch) ----------------

def _ref_layernorm_feats_nchw(x, g, b, eps=1e-5):
    m = jnp.mean(x, axis=2, keepdims=True)
    v = jnp.mean((x - m) ** 2, axis=2, keepdims=True)
    return (x - m) / jnp.sqrt(v + eps) * g[None, None, :, None] \
        + b[None, None, :, None]


def reference_forward(x, p, *, kernel_size):
    K = kernel_size
    pad = ((K // 2, K // 2), (K // 2, K // 2))
    dn = ("NCHW", "OIHW", "NCHW")
    res = x
    h = _ref_layernorm_feats_nchw(x, p["ln1_w"], p["ln1_b"])
    h = jax.nn.gelu(h, approximate=False)
    h = lax.conv_general_dilated(h, p["w1"], (1, 1), pad, dimension_numbers=dn,
                                 precision=lax.Precision.HIGHEST)
    h = h + p["b1"][None, :, None, None]
    h = _ref_layernorm_feats_nchw(h, p["ln2_w"], p["ln2_b"])
    h = jax.nn.gelu(h, approximate=False)
    h = lax.conv_general_dilated(h, p["w2"], (1, 1), pad, dimension_numbers=dn,
                                 precision=lax.Precision.HIGHEST)
    h = h + p["b2"][None, :, None, None]
    return h + res


if __name__ == "__main__":
    # ResidualCNN(in_channels=8, out_channels=8, kernel=3, stride=1,
    #             dropout=0.1 (eval -> identity), n_feats=16)
    B, C, F, T, K = 2, 8, 16, 16, 3
    key = jax.random.PRNGKey(0)
    kx, kw1, kb1, kw2, kb2 = jax.random.split(key, 5)

    fan_in = C * K * K
    bound = 1.0 / sqrt(fan_in)
    params = {
        "w1": jax.random.uniform(kw1, (C, C, K, K), jnp.float32, -bound, bound),
        "b1": jax.random.uniform(kb1, (C,), jnp.float32, -bound, bound),
        "w2": jax.random.uniform(kw2, (C, C, K, K), jnp.float32, -bound, bound),
        "b2": jax.random.uniform(kb2, (C,), jnp.float32, -bound, bound),
        "ln1_w": jnp.ones((F,), jnp.float32),   # nn.LayerNorm default init
        "ln1_b": jnp.zeros((F,), jnp.float32),
        "ln2_w": jnp.ones((F,), jnp.float32),
        "ln2_b": jnp.zeros((F,), jnp.float32),
    }

    # NCHW input: (batch, channels, n_feats, time)
    x = jax.random.normal(kx, (B, C, F, T), jnp.float32)

    out = residual_cnn_forward(x, params, kernel_size=K)
    out = jax.block_until_ready(out)

    ref = reference_forward(x, params, kernel_size=K)
    ref = jax.block_until_ready(ref)

    assert out.shape == x.shape and out.dtype == jnp.float32
    max_err = float(jnp.max(jnp.abs(out - ref)))
    # bf16 MXU conv operands (f32 accumulation) + tanh-GELU vs exact erf in
    # the reference => bf16-level tolerance.
    assert max_err < 2e-2, f"mismatch vs reference: max abs err = {max_err}"
    print("KERNEL_OK")
</pallas_src>

<mosaic_0001>
module attributes {stable_mosaic.version = 11 : i64} {
  func.func @kernel(%arg0: i32, %arg1: memref<2x8x256xf32, #tpu.memory_space<vmem>>, %arg2: memref<9x512xf32, #tpu.memory_space<vmem>>, %arg3: memref<1x256xf32, #tpu.memory_space<vmem>>, %arg4: memref<1x256xf32, #tpu.memory_space<vmem>>, %arg5: memref<8x80xbf16, #tpu.memory_space<vmem>>, %arg6: memref<8x1xf32, #tpu.memory_space<vmem>>, %arg7: memref<1x256xf32, #tpu.memory_space<vmem>>, %arg8: memref<1x256xf32, #tpu.memory_space<vmem>>, %arg9: memref<8x80xbf16, #tpu.memory_space<vmem>>, %arg10: memref<8x1xf32, #tpu.memory_space<vmem>>, %arg11: memref<2x8x256xf32, #tpu.memory_space<vmem>>) attributes {dimension_semantics = [#tpu.dimension_semantics<parallel>], iteration_bounds = array<i64: 1>, scalar_prefetch = 0 : i64, scratch_operands = 0 : i64, tpu.core_type = #tpu.core_type<tc>, window_params = [{transform_indices = @transform_0, window_bounds = array<i64: 2, 8, 256>}, {pipeline_mode = #tpu.pipeline_mode<synchronous>, transform_indices = @transform_1, window_bounds = array<i64: 9, 512>}, {pipeline_mode = #tpu.pipeline_mode<synchronous>, transform_indices = @transform_2, window_bounds = array<i64: 1, 256>}, {pipeline_mode = #tpu.pipeline_mode<synchronous>, transform_indices = @transform_3, window_bounds = array<i64: 1, 256>}, {pipeline_mode = #tpu.pipeline_mode<synchronous>, transform_indices = @transform_4, window_bounds = array<i64: 8, 80>}, {pipeline_mode = #tpu.pipeline_mode<synchronous>, transform_indices = @transform_5, window_bounds = array<i64: 8, 1>}, {pipeline_mode = #tpu.pipeline_mode<synchronous>, transform_indices = @transform_6, window_bounds = array<i64: 1, 256>}, {pipeline_mode = #tpu.pipeline_mode<synchronous>, transform_indices = @transform_7, window_bounds = array<i64: 1, 256>}, {pipeline_mode = #tpu.pipeline_mode<synchronous>, transform_indices = @transform_8, window_bounds = array<i64: 8, 80>}, {pipeline_mode = #tpu.pipeline_mode<synchronous>, transform_indices = @transform_9, window_bounds = array<i64: 8, 1>}, {transform_indices = @transform_10, window_bounds = array<i64: 2, 8, 256>}]} {
    %c0 = arith.constant 0 : index
    %c0_0 = arith.constant 0 : index
    %c0_1 = arith.constant 0 : index
    %0 = vector.load %arg1[%c0, %c0_0, %c0_1] : memref<2x8x256xf32, #tpu.memory_space<vmem>>, vector<2x8x256xf32>
    %1 = vector.shape_cast %0 : vector<2x8x256xf32> to vector<16x256xf32>
    %c16_i32 = arith.constant 16 : i32
    %2 = tpu.dynamic_rotate %1 by %c16_i32 dim 1 : vector<16x256xf32>, i32 -> vector<16x256xf32>
    %3 = arith.addf %1, %2 : vector<16x256xf32>
    %c32_i32 = arith.constant 32 : i32
    %4 = tpu.dynamic_rotate %3 by %c32_i32 dim 1 : vector<16x256xf32>, i32 -> vector<16x256xf32>
    %5 = arith.addf %3, %4 : vector<16x256xf32>
    %c64_i32 = arith.constant 64 : i32
    %6 = tpu.dynamic_rotate %5 by %c64_i32 dim 1 : vector<16x256xf32>, i32 -> vector<16x256xf32>
    %7 = arith.addf %5, %6 : vector<16x256xf32>
    %c128_i32 = arith.constant 128 : i32
    %8 = tpu.dynamic_rotate %7 by %c128_i32 dim 1 : vector<16x256xf32>, i32 -> vector<16x256xf32>
    %9 = arith.addf %7, %8 : vector<16x256xf32>
    %cst = arith.constant 6.250000e-02 : f32
    %10 = vector.broadcast %cst : f32 to vector<16x256xf32>
    %11 = arith.mulf %9, %10 : vector<16x256xf32>
    %12 = arith.subf %1, %11 : vector<16x256xf32>
    %13 = arith.mulf %12, %12 : vector<16x256xf32>
    %c16_i32_2 = arith.constant 16 : i32
    %14 = tpu.dynamic_rotate %13 by %c16_i32_2 dim 1 : vector<16x256xf32>, i32 -> vector<16x256xf32>
    %15 = arith.addf %13, %14 : vector<16x256xf32>
    %c32_i32_3 = arith.constant 32 : i32
    %16 = tpu.dynamic_rotate %15 by %c32_i32_3 dim 1 : vector<16x256xf32>, i32 -> vector<16x256xf32>
    %17 = arith.addf %15, %16 : vector<16x256xf32>
    %c64_i32_4 = arith.constant 64 : i32
    %18 = tpu.dynamic_rotate %17 by %c64_i32_4 dim 1 : vector<16x256xf32>, i32 -> vector<16x256xf32>
    %19 = arith.addf %17, %18 : vector<16x256xf32>
    %c128_i32_5 = arith.constant 128 : i32
    %20 = tpu.dynamic_rotate %19 by %c128_i32_5 dim 1 : vector<16x256xf32>, i32 -> vector<16x256xf32>
    %21 = arith.addf %19, %20 : vector<16x256xf32>
    %cst_6 = arith.constant 6.250000e-02 : f32
    %22 = vector.broadcast %cst_6 : f32 to vector<16x256xf32>
    %23 = arith.mulf %21, %22 : vector<16x256xf32>
    %cst_7 = arith.constant 9.99999974E-6 : f32
    %24 = vector.broadcast %cst_7 : f32 to vector<16x256xf32>
    %25 = arith.addf %23, %24 : vector<16x256xf32>
    %26 = math.rsqrt %25 : vector<16x256xf32>
    %27 = arith.mulf %12, %26 : vector<16x256xf32>
    %c0_8 = arith.constant 0 : index
    %c0_9 = arith.constant 0 : index
    %28 = vector.load %arg3[%c0_8, %c0_9] : memref<1x256xf32, #tpu.memory_space<vmem>>, vector<1x256xf32>
    %29 = vector.broadcast %28 : vector<1x256xf32> to vector<16x256xf32>
    %30 = arith.mulf %27, %29 : vector<16x256xf32>
    %c0_10 = arith.constant 0 : index
    %c0_11 = arith.constant 0 : index
    %31 = vector.load %arg4[%c0_10, %c0_11] : memref<1x256xf32, #tpu.memory_space<vmem>>, vector<1x256xf32>
    %32 = vector.broadcast %31 : vector<1x256xf32> to vector<16x256xf32>
    %33 = arith.addf %30, %32 : vector<16x256xf32>
    %cst_12 = arith.constant 5.000000e-01 : f32
    %34 = vector.broadcast %cst_12 : f32 to vector<16x256xf32>
    %35 = arith.mulf %34, %33 : vector<16x256xf32>
    %36 = arith.mulf %33, %33 : vector<16x256xf32>
    %37 = arith.mulf %36, %33 : vector<16x256xf32>
    %cst_13 = arith.constant 4.471500e-02 : f32
    %38 = vector.broadcast %cst_13 : f32 to vector<16x256xf32>
    %39 = arith.mulf %38, %37 : vector<16x256xf32>
    %40 = arith.addf %33, %39 : vector<16x256xf32>
    %cst_14 = arith.constant 0.797884583 : f32
    %41 = vector.broadcast %cst_14 : f32 to vector<16x256xf32>
    %42 = arith.mulf %41, %40 : vector<16x256xf32>
    %43 = math.tanh %42 : vector<16x256xf32>
    %cst_15 = arith.constant 1.000000e+00 : f32
    %44 = vector.broadcast %cst_15 : f32 to vector<16x256xf32>
    %45 = arith.addf %44, %43 : vector<16x256xf32>
    %46 = arith.mulf %35, %45 : vector<16x256xf32>
    %47 = vector.extract_strided_slice %46 {offsets = [0, 0], sizes = [8, 256], strides = [1, 1]} : vector<16x256xf32> to vector<8x256xf32>
    %48 = vector.extract_strided_slice %46 {offsets = [8, 0], sizes = [8, 256], strides = [1, 1]} : vector<16x256xf32> to vector<8x256xf32>
    %49 = tpu.concatenate %47, %48 in 1 : vector<8x256xf32>, vector<8x256xf32> -> vector<8x512xf32>
    %c17_i32 = arith.constant 17 : i32
    %50 = tpu.dynamic_rotate %49 by %c17_i32 dim 1 : vector<8x512xf32>, i32 -> vector<8x512xf32>
    %c0_16 = arith.constant 0 : index
    %c0_17 = arith.constant 0 : index
    %51 = vector.load %arg2[%c0_16, %c0_17] : memref<9x512xf32, #tpu.memory_space<vmem>>, vector<1x512xf32>
    %52 = vector.broadcast %51 : vector<1x512xf32> to vector<8x512xf32>
    %53 = arith.mulf %50, %52 : vector<8x512xf32>
    %c16_i32_18 = arith.constant 16 : i32
    %54 = tpu.dynamic_rotate %49 by %c16_i32_18 dim 1 : vector<8x512xf32>, i32 -> vector<8x512xf32>
    %c1 = arith.constant 1 : index
    %c0_19 = arith.constant 0 : index
    %55 = vector.load %arg2[%c1, %c0_19] : memref<9x512xf32, #tpu.memory_space<vmem>>, vector<1x512xf32>
    %56 = vector.broadcast %55 : vector<1x512xf32> to vector<8x512xf32>
    %57 = arith.mulf %54, %56 : vector<8x512xf32>
    %c15_i32 = arith.constant 15 : i32
    %58 = tpu.dynamic_rotate %49 by %c15_i32 dim 1 : vector<8x512xf32>, i32 -> vector<8x512xf32>
    %c2 = arith.constant 2 : index
    %c0_20 = arith.constant 0 : index
    %59 = vector.load %arg2[%c2, %c0_20] : memref<9x512xf32, #tpu.memory_space<vmem>>, vector<1x512xf32>
    %60 = vector.broadcast %59 : vector<1x512xf32> to vector<8x512xf32>
    %61 = arith.mulf %58, %60 : vector<8x512xf32>
    %c1_i32 = arith.constant 1 : i32
    %62 = tpu.dynamic_rotate %49 by %c1_i32 dim 1 : vector<8x512xf32>, i32 -> vector<8x512xf32>
    %c3 = arith.constant 3 : index
    %c0_21 = arith.constant 0 : index
    %63 = vector.load %arg2[%c3, %c0_21] : memref<9x512xf32, #tpu.memory_space<vmem>>, vector<1x512xf32>
    %64 = vector.broadcast %63 : vector<1x512xf32> to vector<8x512xf32>
    %65 = arith.mulf %62, %64 : vector<8x512xf32>
    %c4 = arith.constant 4 : index
    %c0_22 = arith.constant 0 : index
    %66 = vector.load %arg2[%c4, %c0_22] : memref<9x512xf32, #tpu.memory_space<vmem>>, vector<1x512xf32>
    %67 = vector.broadcast %66 : vector<1x512xf32> to vector<8x512xf32>
    %68 = arith.mulf %49, %67 : vector<8x512xf32>
    %c511_i32 = arith.constant 511 : i32
    %69 = tpu.dynamic_rotate %49 by %c511_i32 dim 1 : vector<8x512xf32>, i32 -> vector<8x512xf32>
    %c5 = arith.constant 5 : index
    %c0_23 = arith.constant 0 : index
    %70 = vector.load %arg2[%c5, %c0_23] : memref<9x512xf32, #tpu.memory_space<vmem>>, vector<1x512xf32>
    %71 = vector.broadcast %70 : vector<1x512xf32> to vector<8x512xf32>
    %72 = arith.mulf %69, %71 : vector<8x512xf32>
    %c497_i32 = arith.constant 497 : i32
    %73 = tpu.dynamic_rotate %49 by %c497_i32 dim 1 : vector<8x512xf32>, i32 -> vector<8x512xf32>
    %c6 = arith.constant 6 : index
    %c0_24 = arith.constant 0 : index
    %74 = vector.load %arg2[%c6, %c0_24] : memref<9x512xf32, #tpu.memory_space<vmem>>, vector<1x512xf32>
    %75 = vector.broadcast %74 : vector<1x512xf32> to vector<8x512xf32>
    %76 = arith.mulf %73, %75 : vector<8x512xf32>
    %c496_i32 = arith.constant 496 : i32
    %77 = tpu.dynamic_rotate %49 by %c496_i32 dim 1 : vector<8x512xf32>, i32 -> vector<8x512xf32>
    %c7 = arith.constant 7 : index
    %c0_25 = arith.constant 0 : index
    %78 = vector.load %arg2[%c7, %c0_25] : memref<9x512xf32, #tpu.memory_space<vmem>>, vector<1x512xf32>
    %79 = vector.broadcast %78 : vector<1x512xf32> to vector<8x512xf32>
    %80 = arith.mulf %77, %79 : vector<8x512xf32>
    %c495_i32 = arith.constant 495 : i32
    %81 = tpu.dynamic_rotate %49 by %c495_i32 dim 1 : vector<8x512xf32>, i32 -> vector<8x512xf32>
    %c8 = arith.constant 8 : index
    %c0_26 = arith.constant 0 : index
    %82 = vector.load %arg2[%c8, %c0_26] : memref<9x512xf32, #tpu.memory_space<vmem>>, vector<1x512xf32>
    %83 = vector.broadcast %82 : vector<1x512xf32> to vector<8x512xf32>
    %84 = arith.mulf %81, %83 : vector<8x512xf32>
    %cst_27 = arith.constant 0.000000e+00 : f32
    %85 = vector.broadcast %cst_27 : f32 to vector<8x512xf32>
    %86 = tpu.concatenate %53, %57, %61, %65, %68, %72, %76, %80, %84, %85 in 0 : vector<8x512xf32>, vector<8x512xf32>, vector<8x512xf32>, vector<8x512xf32>, vector<8x512xf32>, vector<8x512xf32>, vector<8x512xf32>, vector<8x512xf32>, vector<8x512xf32>, vector<8x512xf32> -> vector<80x512xf32>
    %87 = arith.truncf %86 : vector<80x512xf32> to vector<80x512xbf16>
    %c0_28 = arith.constant 0 : index
    %c0_29 = arith.constant 0 : index
    %88 = vector.load %arg5[%c0_28, %c0_29] : memref<8x80xbf16, #tpu.memory_space<vmem>>, vector<8x80xbf16>
    %cst_30 = arith.constant dense<0.000000e+00> : vector<8x512xf32>
    %89 = tpu.matmul %88, %87, %cst_30 {dimension_numbers = #tpu.dot_dimension_numbers<[1], [0], [0], [1], [0, 0, 1, 1], [], []>} : vector<8x80xbf16>, vector<80x512xbf16>, vector<8x512xf32> -> vector<8x512xf32>
    %c0_31 = arith.constant 0 : index
    %c0_32 = arith.constant 0 : index
    %90 = vector.load %arg6[%c0_31, %c0_32] : memref<8x1xf32, #tpu.memory_space<vmem>>, vector<8x1xf32>
    %91 = vector.broadcast %90 : vector<8x1xf32> to vector<8x512xf32>
    %92 = arith.addf %89, %91 : vector<8x512xf32>
    %93 = vector.extract_strided_slice %92 {offsets = [0, 0], sizes = [8, 256], strides = [1, 1]} : vector<8x512xf32> to vector<8x256xf32>
    %94 = vector.extract_strided_slice %92 {offsets = [0, 256], sizes = [8, 256], strides = [1, 1]} : vector<8x512xf32> to vector<8x256xf32>
    %95 = tpu.concatenate %93, %94 in 0 : vector<8x256xf32>, vector<8x256xf32> -> vector<16x256xf32>
    %c16_i32_33 = arith.constant 16 : i32
    %96 = tpu.dynamic_rotate %95 by %c16_i32_33 dim 1 : vector<16x256xf32>, i32 -> vector<16x256xf32>
    %97 = arith.addf %95, %96 : vector<16x256xf32>
    %c32_i32_34 = arith.constant 32 : i32
    %98 = tpu.dynamic_rotate %97 by %c32_i32_34 dim 1 : vector<16x256xf32>, i32 -> vector<16x256xf32>
    %99 = arith.addf %97, %98 : vector<16x256xf32>
    %c64_i32_35 = arith.constant 64 : i32
    %100 = tpu.dynamic_rotate %99 by %c64_i32_35 dim 1 : vector<16x256xf32>, i32 -> vector<16x256xf32>
    %101 = arith.addf %99, %100 : vector<16x256xf32>
    %c128_i32_36 = arith.constant 128 : i32
    %102 = tpu.dynamic_rotate %101 by %c128_i32_36 dim 1 : vector<16x256xf32>, i32 -> vector<16x256xf32>
    %103 = arith.addf %101, %102 : vector<16x256xf32>
    %cst_37 = arith.constant 6.250000e-02 : f32
    %104 = vector.broadcast %cst_37 : f32 to vector<16x256xf32>
    %105 = arith.mulf %103, %104 : vector<16x256xf32>
    %106 = arith.subf %95, %105 : vector<16x256xf32>
    %107 = arith.mulf %106, %106 : vector<16x256xf32>
    %c16_i32_38 = arith.constant 16 : i32
    %108 = tpu.dynamic_rotate %107 by %c16_i32_38 dim 1 : vector<16x256xf32>, i32 -> vector<16x256xf32>
    %109 = arith.addf %107, %108 : vector<16x256xf32>
    %c32_i32_39 = arith.constant 32 : i32
    %110 = tpu.dynamic_rotate %109 by %c32_i32_39 dim 1 : vector<16x256xf32>, i32 -> vector<16x256xf32>
    %111 = arith.addf %109, %110 : vector<16x256xf32>
    %c64_i32_40 = arith.constant 64 : i32
    %112 = tpu.dynamic_rotate %111 by %c64_i32_40 dim 1 : vector<16x256xf32>, i32 -> vector<16x256xf32>
    %113 = arith.addf %111, %112 : vector<16x256xf32>
    %c128_i32_41 = arith.constant 128 : i32
    %114 = tpu.dynamic_rotate %113 by %c128_i32_41 dim 1 : vector<16x256xf32>, i32 -> vector<16x256xf32>
    %115 = arith.addf %113, %114 : vector<16x256xf32>
    %cst_42 = arith.constant 6.250000e-02 : f32
    %116 = vector.broadcast %cst_42 : f32 to vector<16x256xf32>
    %117 = arith.mulf %115, %116 : vector<16x256xf32>
    %cst_43 = arith.constant 9.99999974E-6 : f32
    %118 = vector.broadcast %cst_43 : f32 to vector<16x256xf32>
    %119 = arith.addf %117, %118 : vector<16x256xf32>
    %120 = math.rsqrt %119 : vector<16x256xf32>
    %121 = arith.mulf %106, %120 : vector<16x256xf32>
    %c0_44 = arith.constant 0 : index
    %c0_45 = arith.constant 0 : index
    %122 = vector.load %arg7[%c0_44, %c0_45] : memref<1x256xf32, #tpu.memory_space<vmem>>, vector<1x256xf32>
    %123 = vector.broadcast %122 : vector<1x256xf32> to vector<16x256xf32>
    %124 = arith.mulf %121, %123 : vector<16x256xf32>
    %c0_46 = arith.constant 0 : index
    %c0_47 = arith.constant 0 : index
    %125 = vector.load %arg8[%c0_46, %c0_47] : memref<1x256xf32, #tpu.memory_space<vmem>>, vector<1x256xf32>
    %126 = vector.broadcast %125 : vector<1x256xf32> to vector<16x256xf32>
    %127 = arith.addf %124, %126 : vector<16x256xf32>
    %cst_48 = arith.constant 5.000000e-01 : f32
    %128 = vector.broadcast %cst_48 : f32 to vector<16x256xf32>
    %129 = arith.mulf %128, %127 : vector<16x256xf32>
    %130 = arith.mulf %127, %127 : vector<16x256xf32>
    %131 = arith.mulf %130, %127 : vector<16x256xf32>
    %cst_49 = arith.constant 4.471500e-02 : f32
    %132 = vector.broadcast %cst_49 : f32 to vector<16x256xf32>
    %133 = arith.mulf %132, %131 : vector<16x256xf32>
    %134 = arith.addf %127, %133 : vector<16x256xf32>
    %cst_50 = arith.constant 0.797884583 : f32
    %135 = vector.broadcast %cst_50 : f32 to vector<16x256xf32>
    %136 = arith.mulf %135, %134 : vector<16x256xf32>
    %137 = math.tanh %136 : vector<16x256xf32>
    %cst_51 = arith.constant 1.000000e+00 : f32
    %138 = vector.broadcast %cst_51 : f32 to vector<16x256xf32>
    %139 = arith.addf %138, %137 : vector<16x256xf32>
    %140 = arith.mulf %129, %139 : vector<16x256xf32>
    %141 = vector.extract_strided_slice %140 {offsets = [0, 0], sizes = [8, 256], strides = [1, 1]} : vector<16x256xf32> to vector<8x256xf32>
    %142 = vector.extract_strided_slice %140 {offsets = [8, 0], sizes = [8, 256], strides = [1, 1]} : vector<16x256xf32> to vector<8x256xf32>
    %143 = tpu.concatenate %141, %142 in 1 : vector<8x256xf32>, vector<8x256xf32> -> vector<8x512xf32>
    %c17_i32_52 = arith.constant 17 : i32
    %144 = tpu.dynamic_rotate %143 by %c17_i32_52 dim 1 : vector<8x512xf32>, i32 -> vector<8x512xf32>
    %c0_53 = arith.constant 0 : index
    %c0_54 = arith.constant 0 : index
    %145 = vector.load %arg2[%c0_53, %c0_54] : memref<9x512xf32, #tpu.memory_space<vmem>>, vector<1x512xf32>
    %146 = vector.broadcast %145 : vector<1x512xf32> to vector<8x512xf32>
    %147 = arith.mulf %144, %146 : vector<8x512xf32>
    %c16_i32_55 = arith.constant 16 : i32
    %148 = tpu.dynamic_rotate %143 by %c16_i32_55 dim 1 : vector<8x512xf32>, i32 -> vector<8x512xf32>
    %c1_56 = arith.constant 1 : index
    %c0_57 = arith.constant 0 : index
    %149 = vector.load %arg2[%c1_56, %c0_57] : memref<9x512xf32, #tpu.memory_space<vmem>>, vector<1x512xf32>
    %150 = vector.broadcast %149 : vector<1x512xf32> to vector<8x512xf32>
    %151 = arith.mulf %148, %150 : vector<8x512xf32>
    %c15_i32_58 = arith.constant 15 : i32
    %152 = tpu.dynamic_rotate %143 by %c15_i32_58 dim 1 : vector<8x512xf32>, i32 -> vector<8x512xf32>
    %c2_59 = arith.constant 2 : index
    %c0_60 = arith.constant 0 : index
    %153 = vector.load %arg2[%c2_59, %c0_60] : memref<9x512xf32, #tpu.memory_space<vmem>>, vector<1x512xf32>
    %154 = vector.broadcast %153 : vector<1x512xf32> to vector<8x512xf32>
    %155 = arith.mulf %152, %154 : vector<8x512xf32>
    %c1_i32_61 = arith.constant 1 : i32
    %156 = tpu.dynamic_rotate %143 by %c1_i32_61 dim 1 : vector<8x512xf32>, i32 -> vector<8x512xf32>
    %c3_62 = arith.constant 3 : index
    %c0_63 = arith.constant 0 : index
    %157 = vector.load %arg2[%c3_62, %c0_63] : memref<9x512xf32, #tpu.memory_space<vmem>>, vector<1x512xf32>
    %158 = vector.broadcast %157 : vector<1x512xf32> to vector<8x512xf32>
    %159 = arith.mulf %156, %158 : vector<8x512xf32>
    %c4_64 = arith.constant 4 : index
    %c0_65 = arith.constant 0 : index
    %160 = vector.load %arg2[%c4_64, %c0_65] : memref<9x512xf32, #tpu.memory_space<vmem>>, vector<1x512xf32>
    %161 = vector.broadcast %160 : vector<1x512xf32> to vector<8x512xf32>
    %162 = arith.mulf %143, %161 : vector<8x512xf32>
    %c511_i32_66 = arith.constant 511 : i32
    %163 = tpu.dynamic_rotate %143 by %c511_i32_66 dim 1 : vector<8x512xf32>, i32 -> vector<8x512xf32>
    %c5_67 = arith.constant 5 : index
    %c0_68 = arith.constant 0 : index
    %164 = vector.load %arg2[%c5_67, %c0_68] : memref<9x512xf32, #tpu.memory_space<vmem>>, vector<1x512xf32>
    %165 = vector.broadcast %164 : vector<1x512xf32> to vector<8x512xf32>
    %166 = arith.mulf %163, %165 : vector<8x512xf32>
    %c497_i32_69 = arith.constant 497 : i32
    %167 = tpu.dynamic_rotate %143 by %c497_i32_69 dim 1 : vector<8x512xf32>, i32 -> vector<8x512xf32>
    %c6_70 = arith.constant 6 : index
    %c0_71 = arith.constant 0 : index
    %168 = vector.load %arg2[%c6_70, %c0_71] : memref<9x512xf32, #tpu.memory_space<vmem>>, vector<1x512xf32>
    %169 = vector.broadcast %168 : vector<1x512xf32> to vector<8x512xf32>
    %170 = arith.mulf %167, %169 : vector<8x512xf32>
    %c496_i32_72 = arith.constant 496 : i32
    %171 = tpu.dynamic_rotate %143 by %c496_i32_72 dim 1 : vector<8x512xf32>, i32 -> vector<8x512xf32>
    %c7_73 = arith.constant 7 : index
    %c0_74 = arith.constant 0 : index
    %172 = vector.load %arg2[%c7_73, %c0_74] : memref<9x512xf32, #tpu.memory_space<vmem>>, vector<1x512xf32>
    %173 = vector.broadcast %172 : vector<1x512xf32> to vector<8x512xf32>
    %174 = arith.mulf %171, %173 : vector<8x512xf32>
    %c495_i32_75 = arith.constant 495 : i32
    %175 = tpu.dynamic_rotate %143 by %c495_i32_75 dim 1 : vector<8x512xf32>, i32 -> vector<8x512xf32>
    %c8_76 = arith.constant 8 : index
    %c0_77 = arith.constant 0 : index
    %176 = vector.load %arg2[%c8_76, %c0_77] : memref<9x512xf32, #tpu.memory_space<vmem>>, vector<1x512xf32>
    %177 = vector.broadcast %176 : vector<1x512xf32> to vector<8x512xf32>
    %178 = arith.mulf %175, %177 : vector<8x512xf32>
    %cst_78 = arith.constant 0.000000e+00 : f32
    %179 = vector.broadcast %cst_78 : f32 to vector<8x512xf32>
    %180 = tpu.concatenate %147, %151, %155, %159, %162, %166, %170, %174, %178, %179 in 0 : vector<8x512xf32>, vector<8x512xf32>, vector<8x512xf32>, vector<8x512xf32>, vector<8x512xf32>, vector<8x512xf32>, vector<8x512xf32>, vector<8x512xf32>, vector<8x512xf32>, vector<8x512xf32> -> vector<80x512xf32>
    %181 = arith.truncf %180 : vector<80x512xf32> to vector<80x512xbf16>
    %c0_79 = arith.constant 0 : index
    %c0_80 = arith.constant 0 : index
    %182 = vector.load %arg9[%c0_79, %c0_80] : memref<8x80xbf16, #tpu.memory_space<vmem>>, vector<8x80xbf16>
    %cst_81 = arith.constant dense<0.000000e+00> : vector<8x512xf32>
    %183 = tpu.matmul %182, %181, %cst_81 {dimension_numbers = #tpu.dot_dimension_numbers<[1], [0], [0], [1], [0, 0, 1, 1], [], []>} : vector<8x80xbf16>, vector<80x512xbf16>, vector<8x512xf32> -> vector<8x512xf32>
    %c0_82 = arith.constant 0 : index
    %c0_83 = arith.constant 0 : index
    %184 = vector.load %arg10[%c0_82, %c0_83] : memref<8x1xf32, #tpu.memory_space<vmem>>, vector<8x1xf32>
    %185 = vector.broadcast %184 : vector<8x1xf32> to vector<8x512xf32>
    %186 = arith.addf %183, %185 : vector<8x512xf32>
    %187 = vector.extract_strided_slice %186 {offsets = [0, 0], sizes = [8, 256], strides = [1, 1]} : vector<8x512xf32> to vector<8x256xf32>
    %188 = vector.extract_strided_slice %186 {offsets = [0, 256], sizes = [8, 256], strides = [1, 1]} : vector<8x512xf32> to vector<8x256xf32>
    %189 = tpu.concatenate %187, %188 in 0 : vector<8x256xf32>, vector<8x256xf32> -> vector<16x256xf32>
    %190 = arith.addf %189, %1 : vector<16x256xf32>
    %191 = vector.shape_cast %190 : vector<16x256xf32> to vector<2x8x256xf32>
    %c0_84 = arith.constant 0 : index
    %c0_85 = arith.constant 0 : index
    %c0_86 = arith.constant 0 : index
    %192 = vector.load %arg11[%c0_84, %c0_85, %c0_86] : memref<2x8x256xf32, #tpu.memory_space<vmem>>, vector<2x8x256xf32>
    tpu.vector_store %arg11[%c0_84, %c0_85, %c0_86], %191 {strides = array<i32>} : memref<2x8x256xf32, #tpu.memory_space<vmem>>, vector<2x8x256xf32>,
    return
  }
  func.func @transform_0(%arg0: i32) -> (i32, i32, i32) {
    %c0_i32 = arith.constant 0 : i32
    %c0_i32_0 = arith.constant 0 : i32
    %c0_i32_1 = arith.constant 0 : i32
    return %arg0, %c0_i32, %c0_i32_0 : i32, i32, i32
  }
  func.func @transform_1(%arg0: i32) -> (i32, i32) {
    %c0_i32 = arith.constant 0 : i32
    %c0_i32_0 = arith.constant 0 : i32
    %c0_i32_1 = arith.constant 0 : i32
    return %c0_i32, %c0_i32_0 : i32, i32
  }
  func.func @transform_2(%arg0: i32) -> (i32, i32) {
    %c0_i32 = arith.constant 0 : i32
    %c0_i32_0 = arith.constant 0 : i32
    %c0_i32_1 = arith.constant 0 : i32
    return %c0_i32, %c0_i32_0 : i32, i32
  }
  func.func @transform_3(%arg0: i32) -> (i32, i32) {
    %c0_i32 = arith.constant 0 : i32
    %c0_i32_0 = arith.constant 0 : i32
    %c0_i32_1 = arith.constant 0 : i32
    return %c0_i32, %c0_i32_0 : i32, i32
  }
  func.func @transform_4(%arg0: i32) -> (i32, i32) {
    %c0_i32 = arith.constant 0 : i32
    %c0_i32_0 = arith.constant 0 : i32
    %c0_i32_1 = arith.constant 0 : i32
    return %c0_i32, %c0_i32_0 : i32, i32
  }
  func.func @transform_5(%arg0: i32) -> (i32, i32) {
    %c0_i32 = arith.constant 0 : i32
    %c0_i32_0 = arith.constant 0 : i32
    %c0_i32_1 = arith.constant 0 : i32
    return %c0_i32, %c0_i32_0 : i32, i32
  }
  func.func @transform_6(%arg0: i32) -> (i32, i32) {
    %c0_i32 = arith.constant 0 : i32
    %c0_i32_0 = arith.constant 0 : i32
    %c0_i32_1 = arith.constant 0 : i32
    return %c0_i32, %c0_i32_0 : i32, i32
  }
  func.func @transform_7(%arg0: i32) -> (i32, i32) {
    %c0_i32 = arith.constant 0 : i32
    %c0_i32_0 = arith.constant 0 : i32
    %c0_i32_1 = arith.constant 0 : i32
    return %c0_i32, %c0_i32_0 : i32, i32
  }
  func.func @transform_8(%arg0: i32) -> (i32, i32) {
    %c0_i32 = arith.constant 0 : i32
    %c0_i32_0 = arith.constant 0 : i32
    %c0_i32_1 = arith.constant 0 : i32
    return %c0_i32, %c0_i32_0 : i32, i32
  }
  func.func @transform_9(%arg0: i32) -> (i32, i32) {
    %c0_i32 = arith.constant 0 : i32
    %c0_i32_0 = arith.constant 0 : i32
    %c0_i32_1 = arith.constant 0 : i32
    return %c0_i32, %c0_i32_0 : i32, i32
  }
  func.func @transform_10(%arg0: i32) -> (i32, i32, i32) {
    %c0_i32 = arith.constant 0 : i32
    %c0_i32_0 = arith.constant 0 : i32
    %c0_i32_1 = arith.constant 0 : i32
    return %arg0, %c0_i32, %c0_i32_0 : i32, i32, i32
  }
}

</mosaic_0001>

<bundles_post_ra>
// kernel: tpu_custom_call.1
= control target key start
LH: loop header
LB: loop body
LE: loop exit
PB: predicated region body
PF: predicated region fallthrough
CT: control target
= control target key end

     0   :  { %15 = vsyncpa [#allocation3], 0  ;;  %s2146_s0 = inlined_call_operand.hbm [shape: f32[2,8,256], index: 0, kind: input, shape index: {}]   ;;  %s2147_s1 = inlined_call_operand.hbm [shape: f32[9,512], index: 1, kind: input, shape index: {}]   ;;  %s2148_s2 = inlined_call_operand.vmem [shape: f32[1,256], index: 2, kind: input, shape index: {}]   ;;  %s2149_s3 = inlined_call_operand.vmem [shape: f32[1,256], index: 3, kind: input, shape index: {}]   ;;  %s2150_s4 = inlined_call_operand.vmem [shape: bf16[8,80], index: 4, kind: input, shape index: {}]   ;;  %s2151_s5 = inlined_call_operand.vmem [shape: f32[8,1], index: 5, kind: input, shape index: {}]   ;;  %s2152_s6 = inlined_call_operand.vmem [shape: f32[1,256], index: 6, kind: input, shape index: {}]   ;;  %s2153_s7 = inlined_call_operand.vmem [shape: f32[1,256], index: 7, kind: input, shape index: {}]   ;;  %s2154_s8 = inlined_call_operand.vmem [shape: bf16[8,80], index: 8, kind: input, shape index: {}]   ;;  %s2155_s9 = inlined_call_operand.vmem [shape: f32[8,1], index: 9, kind: input, shape index: {}]   ;;  %s2156_s10 = inlined_call_operand.hbm [shape: f32[2,8,256], index: 10, kind: output, shape index: {}]  }
   0x1   :  { %16 = vsyncpa [#allocation6], 0 }
   0x2   :  { %17 = vsyncpa [#allocation4], 0  ;;  %s1300_s13 = smov [#allocation2]   ;;  %s1228_s17 = scalar_lea.hbm %s2146_s0, 512 }
   0x3   :  { %s23_s14 = sshll.u32 %s1300_s13, 4  ;;  %p1229_p0 = scmp.ne.s32.totalorder %s2146_s0, %s1228_s17  ;;  %s24_s14 = int_to_ptr.vmem [resolvable:$true] %s23_s14 }
   0x4   :  { %p1232_p1 = scmp.lt.u32.totalorder %s1228_s17, %s2146_s0 }
   0x6   :  { %p1234_p2 = pnand %p1232_p1, %p1229_p0 }
   0x8   :  { %1237 = shalt.err (!%p1234_p2)
}
   0x9   :  { %s1238_s22 = scalar_lea.vmem %s24_s14, 512  ;;  %p1243_p4 = scmp.lt.s32.totalorder %s24_s14, %s24_s14 }
   0xa   :  { %p1239_p3 = scmp.ne.s32.totalorder %s24_s14, %s1238_s22  ;;  %p1244_p5 = scmp.lt.s32.totalorder %s1238_s22, %s1238_s22 }
   0xc   :  { %p1245_p6 = por %p1244_p5, %p1243_p4 }
   0xe   :  { %p1246_p7 = pnand %p1245_p6, %p1239_p3 }
  0x10   :  { %1249 = shalt.err (!%p1246_p7)
}
  0x11   :  { %s1301_s23 = smov 256   ;;  %s1302_s24 = smov 16  }
  0x12   :  { %29 = dma.hbm_to_vmem [thread:$0]  %s2146_s0, 512, %s24_s14, [#allocation3], %s1301_s23, %s1301_s23, %s1302_s24  }
  0x13   :  { %s1303_s27 = smov [#allocation5]   ;;  %s1250_s11 = scalar_lea.hbm %s2147_s1, 1024 }
  0x14   :  { %s35_s28 = sshll.u32 %s1303_s27, 4  ;;  %p1251_p8 = scmp.ne.s32.totalorder %s2147_s1, %s1250_s11  ;;  %s36_s28 = int_to_ptr.vmem [resolvable:$true] %s35_s28 }
  0x15   :  { %p1254_p9 = scmp.lt.u32.totalorder %s1250_s11, %s2147_s1 }
  0x17   :  { %p1256_p10 = pnand %p1254_p9, %p1251_p8 }
  0x19   :  { %1259 = shalt.err (!%p1256_p10)
}
  0x1a   :  { %s1260_s17 = scalar_lea.vmem %s36_s28, 1024  ;;  %p1265_p12 = scmp.lt.s32.totalorder %s36_s28, %s36_s28 }
  0x1b   :  { %p1261_p11 = scmp.ne.s32.totalorder %s36_s28, %s1260_s17  ;;  %p1266_p13 = scmp.lt.s32.totalorder %s1260_s17, %s1260_s17 }
  0x1d   :  { %p1267_p0 = por %p1266_p13, %p1265_p12 }
  0x1f   :  { %p1268_p1 = pnand %p1267_p0, %p1261_p11 }
  0x21   :  { %1271 = shalt.err (!%p1268_p1)
}
  0x22   :  { %s1304_s0 = smov 512   ;;  %s1305_s14 = smov 32  }
  0x23   :  { %41 = dma.hbm_to_vmem [thread:$0]  %s2147_s1, 1024, %s36_s28, [#allocation6], %s1304_s0, %s1304_s0, %s1305_s14  }
  0x24   :  { %1294 = dma.done.wait [#allocation3], 512  }
  0x25   :  { %1295 = vsyncadd [#allocation3], 4294966784 }
  0x26   :  { %1296 = dma.done.wait [#allocation6], 1024  }
  0x27   :  { %1297 = vsyncadd [#allocation6], 4294966272  ;;  %v1400_v0 = vld [vmem:[#allocation2 + $0x8] sm:$0xff]  ;;  %v65_v1 = vld [vmem:[#allocation2] sm:$0xff]  ;;  %v77_v4 = vlaneseq  ;;  %s1306_s1 = smov 64   ;;  %s1309_s26 = smov 1  }
  0x28   :  { %73 = vrot.lane.b32.xlu1 %v1400_v0, %s1302_s24  ;;  %69 = vrot.lane.b32.xlu0 %v65_v1, %s1302_s24  ;;  %v1405_v2 = vld [vmem:[#allocation2 + $0x18] sm:$0xff]  ;;  %v67_v3 = vld [vmem:[#allocation2 + $0x10] sm:$0xff]  ;;  %s1310_s27 = smov 127   ;;  %s1311_s28 = smov 113   ;;  %vm634_vm10 = vcmask 654336  }
  0x29   :  { %v1411_v5 = vand.u32 127, %v77_v4  ;;  %s1312_s29 = smov 112   ;;  %s1314_s30 = smov 111  }
  0x2b   :  { %vm79_vm0 = vcmp.lt.s32.totalorder %v1411_v5, 16  ;;  %vm96_vm1 = vcmp.lt.s32.totalorder %v1411_v5, 32  ;;  %vm113_vm2 = vcmp.lt.s32.totalorder %v1411_v5, 64  ;;  %vm270_vm3 = vcmp.lt.s32.totalorder %v1411_v5, 17 }
  0x2c   :  { %75 = vrot.lane.b32.xlu1 %v1405_v2, %s1302_s24  ;;  %71 = vrot.lane.b32.xlu0 %v67_v3, %s1302_s24  ;;  %vm348_vm4 = vcmp.lt.s32.totalorder %v1411_v5, 15  ;;  %vm388_vm5 = vcmp.lt.s32.totalorder %v1411_v5, 1  ;;  %vm455_vm6 = vcmp.lt.s32.totalorder %v1411_v5, 127  ;;  %vm495_vm7 = vcmp.lt.s32.totalorder %v1411_v5, 113 }
  0x2d   :  { %vm535_vm8 = vcmp.lt.s32.totalorder %v1411_v5, 112  ;;  %vm575_vm9 = vcmp.lt.s32.totalorder %v1411_v5, 111  ;;  %v1060_v5 = vld [vmem:[%s2154_s8] sm:$0xf] }
  0x9a   :  { %v74_v6 = vpop.permute.xlu1 %73  ;;  %v70_v7 = vpop.permute.xlu0 %69 }
  0x9b   :  { %v82_v8 = vsel %vm79_vm0, %v74_v6, %v70_v7  ;;  %v80_v10 = vsel %vm79_vm0, %v70_v7, %v74_v6 }
  0x9c   :  { %v84_v9 = vadd.f32 %v82_v8, %v65_v1  ;;  %v85_v14 = vadd.f32 %v80_v10, %v1400_v0 }
  0x9e   :  { %v76_v11 = vpop.permute.xlu1 %75  ;;  %88 = vrot.lane.b32.xlu0 %v84_v9, %s1305_s14  ;;  %v72_v12 = vpop.permute.xlu0 %71 }
  0x9f   :  { %v83_v13 = vsel %vm79_vm0, %v76_v11, %v72_v12  ;;  %v81_v16 = vsel %vm79_vm0, %v72_v12, %v76_v11 }
  0xa0   :  { %v86_v15 = vadd.f32 %v83_v13, %v67_v3  ;;  %v87_v17 = vadd.f32 %v81_v16, %v1405_v2 }
  0xa2   :  { %92 = vrot.lane.b32.xlu0 %v85_v14, %s1305_s14  ;;  %90 = vrot.lane.b32.xlu1 %v86_v15, %s1305_s14 }
  0xa6   :  { %94 = vrot.lane.b32.xlu1 %v87_v17, %s1305_s14 }
 0x110   :  { %v89_v18 = vpop.permute.xlu0 %88 }
 0x114   :  { %v91_v19 = vpop.permute.xlu1 %90  ;;  %v93_v20 = vpop.permute.xlu0 %92 }
 0x115   :  { %v99_v21 = vsel %vm96_vm1, %v93_v20, %v89_v18  ;;  %v97_v23 = vsel %vm96_vm1, %v89_v18, %v93_v20 }
 0x116   :  { %v101_v22 = vadd.f32 %v99_v21, %v84_v9  ;;  %v102_v27 = vadd.f32 %v97_v23, %v85_v14 }
 0x118   :  { %v95_v24 = vpop.permute.xlu1 %94  ;;  %105 = vrot.lane.b32.xlu0 %v101_v22, %s1306_s1 }
 0x119   :  { %v100_v25 = vsel %vm96_vm1, %v95_v24, %v91_v19  ;;  %v98_v28 = vsel %vm96_vm1, %v91_v19, %v95_v24 }
 0x11a   :  { %v103_v26 = vadd.f32 %v100_v25, %v86_v15  ;;  %v104_v29 = vadd.f32 %v98_v28, %v87_v17 }
 0x11c   :  { %107 = vrot.lane.b32.xlu1 %v103_v26, %s1306_s1  ;;  %109 = vrot.lane.b32.xlu0 %v102_v27, %s1306_s1 }
 0x120   :  { %111 = vrot.lane.b32.xlu1 %v104_v29, %s1306_s1 }
 0x18a   :  { %v106_v30 = vpop.permute.xlu0 %105 }
 0x18e   :  { %v108_v31 = vpop.permute.xlu1 %107  ;;  %v110_v32 = vpop.permute.xlu0 %109 }
 0x18f   :  { %v114_v33 = vsel %vm113_vm2, %v106_v30, %v110_v32  ;;  %v116_v34 = vsel %vm113_vm2, %v110_v32, %v106_v30 }
 0x190   :  { %v118_v35 = vadd.f32 %v116_v34, %v101_v22  ;;  %v119_v36 = vadd.f32 %v114_v33, %v102_v27  ;;  %v1505_v33 = vshrl.u32 %v77_v4, 7 }
 0x192   :  { %v112_v37 = vpop.permute.xlu1 %111  ;;  %v122_v38 = vadd.f32 %v119_v36, %v118_v35  ;;  %v1508_v35 = vsub.s32 0, %v1505_v33  ;;  %v1511_v36 = vsub.s32 1, %v1505_v33 }
 0x193   :  { %v115_v39 = vsel %vm113_vm2, %v108_v31, %v112_v37  ;;  %v117_v40 = vsel %vm113_vm2, %v112_v37, %v108_v31  ;;  %v194_v37 = vld [vmem:[%s2148_s2] sm:$0x3]  ;;  %s1307_s2 = smov 17  }
 0x194   :  { %v120_v41 = vadd.f32 %v117_v40, %v103_v26  ;;  %v121_v42 = vadd.f32 %v115_v39, %v104_v29  ;;  %v124_v43 = vmul.f32 0.0625, %v122_v38  ;;  %v210_v38 = vld [vmem:[%s2149_s3] sm:$0x3]  ;;  %v199_v39 = vrot.slane %v194_v37, %v1508_v35  ;;  %s1308_s3 = smov 15  }
 0x195   :  { %v203_v4 = vrot.slane %v194_v37, %v1511_v36  ;;  %v275_v37 = vld [vmem:[#allocation5] ss:$8 sm:$0xf] }
 0x196   :  { %v1450_v44 = vsub.f32 %v65_v1, %v124_v43  ;;  %v123_v45 = vadd.f32 %v121_v42, %v120_v41  ;;  %v1455_v48 = vsub.f32 %v1400_v0, %v124_v43  ;;  %v215_v41 = vrot.slane %v210_v38, %v1508_v35 }
 0x197   :  { %v219_v42 = vrot.slane %v210_v38, %v1511_v36 }
 0x198   :  { %v130_v46 = vmul.f32 %v1450_v44, %v1450_v44  ;;  %v125_v47 = vmul.f32 0.0625, %v123_v45  ;;  %v131_v51 = vmul.f32 %v1455_v48, %v1455_v48 }
 0x19a   :  { %134 = vrot.lane.b32.xlu0 %v130_v46, %s1302_s24  ;;  %v1458_v49 = vsub.f32 %v67_v3, %v125_v47  ;;  %v1465_v52 = vsub.f32 %v1405_v2, %v125_v47 }
 0x19c   :  { %v132_v50 = vmul.f32 %v1458_v49, %v1458_v49  ;;  %v133_v53 = vmul.f32 %v1465_v52, %v1465_v52 }
 0x19e   :  { %136 = vrot.lane.b32.xlu1 %v132_v50, %s1302_s24  ;;  %138 = vrot.lane.b32.xlu0 %v131_v51, %s1302_s24 }
 0x1a2   :  { %140 = vrot.lane.b32.xlu1 %v133_v53, %s1302_s24 }
 0x20c   :  { %v135_v54 = vpop.permute.xlu0 %134 }
 0x210   :  { %v137_v55 = vpop.permute.xlu1 %136  ;;  %v139_v56 = vpop.permute.xlu0 %138 }
 0x211   :  { %v144_v57 = vsel %vm79_vm0, %v139_v56, %v135_v54  ;;  %v142_v59 = vsel %vm79_vm0, %v135_v54, %v139_v56 }
 0x212   :  { %v146_v58 = vadd.f32 %v144_v57, %v130_v46  ;;  %v147_v63 = vadd.f32 %v142_v59, %v131_v51 }
 0x214   :  { %v141_v60 = vpop.permute.xlu1 %140  ;;  %150 = vrot.lane.b32.xlu0 %v146_v58, %s1305_s14 }
 0x215   :  { %v145_v61 = vsel %vm79_vm0, %v141_v60, %v137_v55  ;;  %v143_v0 = vsel %vm79_vm0, %v137_v55, %v141_v60 }
 0x216   :  { %v148_v62 = vadd.f32 %v145_v61, %v132_v50  ;;  %v149_v1 = vadd.f32 %v143_v0, %v133_v53 }
 0x218   :  { %152 = vrot.lane.b32.xlu1 %v148_v62, %s1305_s14  ;;  %154 = vrot.lane.b32.xlu0 %v147_v63, %s1305_s14 }
 0x21c   :  { %156 = vrot.lane.b32.xlu1 %v149_v1, %s1305_s14 }
 0x286   :  { %v151_v2 = vpop.permute.xlu0 %150 }
 0x28a   :  { %v153_v3 = vpop.permute.xlu1 %152  ;;  %v155_v6 = vpop.permute.xlu0 %154 }
 0x28b   :  { %v160_v7 = vsel %vm96_vm1, %v155_v6, %v151_v2  ;;  %v158_v9 = vsel %vm96_vm1, %v151_v2, %v155_v6 }
 0x28c   :  { %v162_v8 = vadd.f32 %v160_v7, %v146_v58  ;;  %v163_v12 = vadd.f32 %v158_v9, %v147_v63 }
 0x28e   :  { %v157_v10 = vpop.permute.xlu1 %156  ;;  %166 = vrot.lane.b32.xlu0 %v162_v8, %s1306_s1 }
 0x28f   :  { %v161_v11 = vsel %vm96_vm1, %v157_v10, %v153_v3  ;;  %v159_v14 = vsel %vm96_vm1, %v153_v3, %v157_v10 }
 0x290   :  { %v164_v13 = vadd.f32 %v161_v11, %v148_v62  ;;  %v165_v15 = vadd.f32 %v159_v14, %v149_v1 }
 0x292   :  { %168 = vrot.lane.b32.xlu1 %v164_v13, %s1306_s1  ;;  %170 = vrot.lane.b32.xlu0 %v163_v12, %s1306_s1 }
 0x296   :  { %172 = vrot.lane.b32.xlu1 %v165_v15, %s1306_s1 }
 0x300   :  { %v167_v16 = vpop.permute.xlu0 %166 }
 0x304   :  { %v169_v17 = vpop.permute.xlu1 %168  ;;  %v171_v18 = vpop.permute.xlu0 %170 }
 0x305   :  { %v174_v19 = vsel %vm113_vm2, %v167_v16, %v171_v18  ;;  %v176_v20 = vsel %vm113_vm2, %v171_v18, %v167_v16 }
 0x306   :  { %v178_v21 = vadd.f32 %v176_v20, %v162_v8  ;;  %v179_v22 = vadd.f32 %v174_v19, %v163_v12 }
 0x308   :  { %v182_v23 = vadd.f32 %v179_v22, %v178_v21  ;;  %v173_v24 = vpop.permute.xlu1 %172 }
 0x309   :  { %v175_v25 = vsel %vm113_vm2, %v169_v17, %v173_v24  ;;  %v177_v26 = vsel %vm113_vm2, %v173_v24, %v169_v17 }
 0x30a   :  { %v184_v27 = vmul.f32 0.0625, %v182_v23  ;;  %v180_v28 = vadd.f32 %v177_v26, %v164_v13  ;;  %v181_v29 = vadd.f32 %v175_v25, %v165_v15 }
 0x30c   :  { %v186_v30 = vadd.f32 1e-05, %v184_v27  ;;  %v183_v31 = vadd.f32 %v181_v29, %v180_v28 }
 0x30e   :  { %1200 = vrsqrt.f32 %v186_v30  ;;  %v185_v32 = vmul.f32 0.0625, %v183_v31  ;;  %v1313_v30 = vmov 0   ;;  %v628_v31 = vld [vmem:[%s2151_s5] sm:$0xff] }
 0x30f   :  { %670 = vmatprep.mubr.bf16.mxu0 %v1313_v30  ;;  %711 = vmatprep.mubr.bf16.mxu1 %v1313_v30 }
 0x310   :  { %v187_v34 = vadd.f32 1e-05, %v185_v32  ;;  %1199 = vset.pattern.permute.xlu0 %v1313_v30 }
 0x312   :  { %1202 = vrsqrt.f32 %v187_v34 }
 0x318   :  { %v1201_v40 = vpop.eup %1200 }
 0x319   :  { %v190_v43 = vmul.f32 %v1201_v40, %v1450_v44  ;;  %v191_v45 = vmul.f32 %v1201_v40, %v1455_v48  ;;  %v1607_v40 = vsub.s32 2, %v1505_v33 }
 0x31b   :  { %v206_v46 = vmul.f32 %v199_v39, %v190_v43  ;;  %v207_v47 = vmul.f32 %v203_v4, %v191_v45 }
 0x31c   :  { %v1203_v50 = vpop.eup %1202 }
 0x31d   :  { %v222_v51 = vadd.f32 %v215_v41, %v206_v46  ;;  %v223_v53 = vadd.f32 %v219_v42, %v207_v47  ;;  %v192_v54 = vmul.f32 %v1203_v50, %v1458_v49  ;;  %v193_v55 = vmul.f32 %v1203_v50, %v1465_v52 }
 0x31e   :  { %v1618_v46 = vsub.s32 3, %v1505_v33  ;;  %v1621_v47 = vrot.slane %v275_v37, %v1508_v35  ;;  %v1624_v50 = vrot.slane %v275_v37, %v1607_v40 }
 0x31f   :  { %v230_v56 = vmul.f32 %v222_v51, %v222_v51  ;;  %v231_v57 = vmul.f32 %v223_v53, %v223_v53  ;;  %v208_v58 = vmul.f32 %v199_v39, %v192_v54  ;;  %v209_v59 = vmul.f32 %v203_v4, %v193_v55  ;;  %v314_v39 = vld [vmem:[#allocation5 + $0x1] ss:$8 sm:$0xf] }
 0x320   :  { %v226_v16 = vmul.f32 0.5, %v222_v51  ;;  %v227_v18 = vmul.f32 0.5, %v223_v53  ;;  %v1629_v54 = vrot.slane %v314_v39, %v1508_v35  ;;  %v1632_v55 = vrot.slane %v314_v39, %v1607_v40 }
 0x321   :  { %v234_v60 = vmul.f32 %v230_v56, %v222_v51  ;;  %v235_v61 = vmul.f32 %v231_v57, %v223_v53  ;;  %v224_v62 = vadd.f32 %v215_v41, %v208_v58  ;;  %v225_v63 = vadd.f32 %v219_v42, %v209_v59 }
 0x322   :  { %v1610_v41 = vrot.slane %v275_v37, %v1511_v36  ;;  %v1613_v42 = vrot.slane %v314_v39, %v1511_v36  ;;  %v1635_v56 = vrot.slane %v275_v37, %v1618_v46  ;;  %v1642_v59 = vrot.slane %v314_v39, %v1618_v46 }
 0x323   :  { %v238_v44 = vmul.f32 0.044715, %v234_v60  ;;  %v239_v0 = vmul.f32 0.044715, %v235_v61  ;;  %v232_v48 = vmul.f32 %v224_v62, %v224_v62  ;;  %v233_v1 = vmul.f32 %v225_v63, %v225_v63 }
 0x324   :  { %v228_v24 = vmul.f32 0.5, %v224_v62  ;;  %v229_v26 = vmul.f32 0.5, %v225_v63 }
 0x325   :  { %v242_v2 = vadd.f32 %v238_v44, %v222_v51  ;;  %v243_v3 = vadd.f32 %v239_v0, %v223_v53  ;;  %v236_v6 = vmul.f32 %v232_v48, %v224_v62  ;;  %v237_v7 = vmul.f32 %v233_v1, %v225_v63 }
 0x327   :  { %v246_v8 = vmul.f32 0.7978846, %v242_v2  ;;  %v247_v49 = vmul.f32 0.7978846, %v243_v3  ;;  %v240_v9 = vmul.f32 0.044715, %v236_v6 }
 0x328   :  { %v241_v52 = vmul.f32 0.044715, %v237_v7 }
 0x329   :  { %1204 = vtanh.f32 %v246_v8  ;;  %v244_v10 = vadd.f32 %v240_v9, %v224_v62 }
 0x32a   :  { %1206 = vtanh.f32 %v247_v49  ;;  %v245_v11 = vadd.f32 %v241_v52, %v225_v63 }
 0x32b   :  { %v248_v12 = vmul.f32 0.7978846, %v244_v10 }
 0x32c   :  { %v249_v13 = vmul.f32 0.7978846, %v245_v11 }
 0x32d   :  { %1208 = vtanh.f32 %v248_v12 }
 0x32e   :  { %1210 = vtanh.f32 %v249_v13  ;;  %v354_v13 = vld [vmem:[#allocation5 + $0x2] ss:$8 sm:$0xf] }
 0x333   :  { %v1205_v14 = vpop.eup %1204 }
 0x334   :  { %v1207_v15 = vpop.eup %1206  ;;  %v254_v17 = vadd.f32 1.0, %v1205_v14 }
 0x335   :  { %v255_v19 = vadd.f32 1.0, %v1207_v15  ;;  %v394_v15 = vld [vmem:[#allocation5 + $0x3] ss:$8 sm:$0xf] }
 0x336   :  { %v1527_v20 = vmul.f32 %v254_v17, %v226_v16  ;;  %v1662_v17 = vrot.slane %v354_v13, %v1511_v36  ;;  %v1692_v39 = vrot.slane %v394_v15, %v1618_v46 }
 0x337   :  { %v1529_v21 = vmul.f32 %v255_v19, %v227_v18  ;;  %v1209_v22 = vpop.eup %1208  ;;  %v1666_v18 = vrot.slane %v394_v15, %v1511_v36 }
 0x338   :  { %262 = vrot.lane.b32.xlu0 %v1527_v20, %s1307_s2  ;;  %v1211_v23 = vpop.eup %1210  ;;  %v256_v25 = vadd.f32 1.0, %v1209_v22 }
 0x339   :  { %264 = vrot.lane.b32.xlu1 %v1529_v21, %s1307_s2  ;;  %v257_v27 = vadd.f32 1.0, %v1211_v23  ;;  %v1671_v23 = vrot.slane %v354_v13, %v1508_v35 }
 0x33a   :  { %v1535_v28 = vmul.f32 %v256_v25, %v228_v24  ;;  %v1674_v24 = vrot.slane %v354_v13, %v1607_v40 }
 0x33b   :  { %v1537_v29 = vmul.f32 %v257_v27, %v229_v26  ;;  %v1677_v26 = vrot.slane %v354_v13, %v1618_v46 }
 0x33c   :  { %266 = vrot.lane.b32.xlu0 %v1535_v28, %s1307_s2 }
 0x33d   :  { %268 = vrot.lane.b32.xlu1 %v1537_v29, %s1307_s2 }
 0x340   :  { %301 = vrot.lane.b32.xlu0 %v1527_v20, %s1302_s24 }
 0x341   :  { %303 = vrot.lane.b32.xlu1 %v1529_v21, %s1302_s24 }
 0x344   :  { %305 = vrot.lane.b32.xlu0 %v1535_v28, %s1302_s24 }
 0x345   :  { %307 = vrot.lane.b32.xlu1 %v1537_v29, %s1302_s24 }
 0x348   :  { %340 = vrot.lane.b32.xlu0 %v1527_v20, %s1308_s3 }
 0x349   :  { %342 = vrot.lane.b32.xlu1 %v1529_v21, %s1308_s3 }
 0x34c   :  { %344 = vrot.lane.b32.xlu0 %v1535_v28, %s1308_s3 }
 0x34d   :  { %346 = vrot.lane.b32.xlu1 %v1537_v29, %s1308_s3 }
 0x350   :  { %380 = vrot.lane.b32.xlu0 %v1527_v20, %s1309_s26 }
 0x351   :  { %382 = vrot.lane.b32.xlu1 %v1529_v21, %s1309_s26 }
 0x354   :  { %384 = vrot.lane.b32.xlu0 %v1535_v28, %s1309_s26 }
 0x355   :  { %386 = vrot.lane.b32.xlu1 %v1537_v29, %s1309_s26 }
 0x358   :  { %447 = vrot.lane.b32.xlu0 %v1527_v20, %s1310_s27 }
 0x359   :  { %449 = vrot.lane.b32.xlu1 %v1529_v21, %s1310_s27 }
 0x35c   :  { %451 = vrot.lane.b32.xlu0 %v1535_v28, %s1310_s27 }
 0x35d   :  { %453 = vrot.lane.b32.xlu1 %v1537_v29, %s1310_s27 }
 0x360   :  { %487 = vrot.lane.b32.xlu0 %v1527_v20, %s1311_s28 }
 0x361   :  { %489 = vrot.lane.b32.xlu1 %v1529_v21, %s1311_s28 }
 0x364   :  { %491 = vrot.lane.b32.xlu0 %v1535_v28, %s1311_s28 }
 0x365   :  { %493 = vrot.lane.b32.xlu1 %v1537_v29, %s1311_s28 }
 0x368   :  { %527 = vrot.lane.b32.xlu0 %v1527_v20, %s1312_s29 }
 0x369   :  { %529 = vrot.lane.b32.xlu1 %v1529_v21, %s1312_s29 }
 0x36c   :  { %531 = vrot.lane.b32.xlu0 %v1535_v28, %s1312_s29 }
 0x36d   :  { %533 = vrot.lane.b32.xlu1 %v1537_v29, %s1312_s29 }
 0x370   :  { %567 = vrot.lane.b32.xlu0 %v1527_v20, %s1314_s30 }
 0x371   :  { %569 = vrot.lane.b32.xlu1 %v1529_v21, %s1314_s30 }
 0x374   :  { %571 = vrot.lane.b32.xlu0 %v1535_v28, %s1314_s30 }
 0x375   :  { %573 = vrot.lane.b32.xlu1 %v1537_v29, %s1314_s30 }
 0x378   :  { %631 = vperm.xlu0 %1199, %v628_v31   ;;  %v1682_v31 = vrot.slane %v394_v15, %v1508_v35 }
 0x3aa   :  { %v263_v32 = vpop.permute.xlu0 %262 }
 0x3ab   :  { %v265_v34 = vpop.permute.xlu1 %264 }
 0x3ac   :  { %v273_v43 = vsel %vm270_vm3, %v263_v32, %v265_v34 }
 0x3ad   :  { %v298_v57 = vmul.f32 %v1610_v41, %v273_v43 }
 0x3ae   :  { %v267_v38 = vpop.permute.xlu0 %266 }
 0x3af   :  { %v269_v4 = vpop.permute.xlu1 %268  ;;  %v272_v33 = vsel %vm270_vm3, %v265_v34, %v267_v38 }
 0x3b0   :  { %v274_v60 = vsel %vm270_vm3, %v269_v4, %v263_v32  ;;  %v271_v61 = vsel %vm270_vm3, %v267_v38, %v269_v4  ;;  %v299_v48 = vmul.f32 %v1624_v50, %v272_v33  ;;  %v1685_v32 = vrot.slane %v394_v15, %v1607_v40 }
 0x3b1   :  { %v297_v6 = vmul.f32 %v1621_v47, %v274_v60  ;;  %v300_v8 = vmul.f32 %v1635_v56, %v271_v61 }
 0x3b2   :  { %v302_v45 = vpop.permute.xlu0 %301 }
 0x3b3   :  { %v304_v51 = vpop.permute.xlu1 %303 }
 0x3b4   :  { %v311_v53 = vsel %vm79_vm0, %v302_v45, %v304_v51 }
 0x3b5   :  { %v337_v58 = vmul.f32 %v1613_v42, %v311_v53 }
 0x3b6   :  { %v306_v62 = vpop.permute.xlu0 %305 }
 0x3b7   :  { %v308_v63 = vpop.permute.xlu1 %307  ;;  %v310_v44 = vsel %vm79_vm0, %v304_v51, %v306_v62  ;;  %v608_v0 = vpack.c.bf16 %v337_v58, %v298_v57 }
 0x3b8   :  { %v312_v1 = vsel %vm79_vm0, %v308_v63, %v302_v45  ;;  %v309_v2 = vsel %vm79_vm0, %v306_v62, %v308_v63  ;;  %v338_v3 = vmul.f32 %v1632_v55, %v310_v44  ;;  %v461_v62 = vld [vmem:[#allocation5 + $0x5] ss:$8 sm:$0xf]  ;;  %v421_v63 = vld [vmem:[#allocation5 + $0x4] ss:$8 sm:$0xf] }
 0x3b9   :  { %v336_v7 = vmul.f32 %v1629_v54, %v312_v1  ;;  %638 = vmatprep.subr.bf16.mxu0 %v608_v0  ;;  %v339_v49 = vmul.f32 %v1642_v59, %v309_v2  ;;  %v1729_v13 = vrot.slane %v461_v62, %v1618_v46  ;;  %v1735_v15 = vrot.slane %v421_v63, %v1607_v40 }
 0x3ba   :  { %v341_v9 = vpop.permute.xlu0 %340  ;;  %v609_v52 = vpack.c.bf16 %v338_v3, %v299_v48 }
 0x3bb   :  { %v343_v10 = vpop.permute.xlu1 %342  ;;  %v607_v11 = vpack.c.bf16 %v336_v7, %v297_v6  ;;  %v610_v12 = vpack.c.bf16 %v339_v49, %v300_v8  ;;  %v1712_v7 = vrot.slane %v461_v62, %v1508_v35 }
 0x3bc   :  { %v351_v19 = vsel %vm348_vm4, %v341_v9, %v343_v10 }
 0x3bd   :  { %639 = vmatpush1.bf16.msra.mxu0 %v607_v11  ;;  %679 = vmatprep.subr.bf16.mxu1 %v610_v12  ;;  %v377_v34 = vmul.f32 %v1662_v17, %v351_v19  ;;  %v1723_v11 = vrot.slane %v421_v63, %v1511_v36  ;;  %v1726_v12 = vrot.slane %v421_v63, %v1618_v46 }
 0x3be   :  { %680 = vmatpush1.bf16.msra.mxu1 %v609_v52  ;;  %v345_v14 = vpop.permute.xlu0 %344 }
 0x3bf   :  { %v347_v16 = vpop.permute.xlu1 %346  ;;  %v350_v37 = vsel %vm348_vm4, %v343_v10, %v345_v14  ;;  %v1720_v10 = vrot.slane %v461_v62, %v1511_v36 }
 0x3c0   :  { %v352_v4 = vsel %vm348_vm4, %v347_v16, %v341_v9  ;;  %v349_v43 = vsel %vm348_vm4, %v345_v14, %v347_v16  ;;  %v378_v57 = vmul.f32 %v1674_v24, %v350_v37  ;;  %v1715_v9 = vrot.slane %v421_v63, %v1508_v35  ;;  %v501_v63 = vld [vmem:[#allocation5 + $0x6] ss:$8 sm:$0xf] }
 0x3c1   :  { %v376_v44 = vmul.f32 %v1671_v23, %v352_v4  ;;  %v379_v0 = vmul.f32 %v1677_v26, %v349_v43  ;;  %v1732_v14 = vrot.slane %v461_v62, %v1607_v40  ;;  %v444_v4 = vmul.f32 %v1723_v11, %v1529_v21 }
 0x3c2   :  { %v381_v22 = vpop.permute.xlu0 %380 }
 0x3c3   :  { %v383_v25 = vpop.permute.xlu1 %382 }
 0x3c4   :  { %v391_v27 = vsel %vm388_vm5, %v381_v22, %v383_v25 }
 0x3c5   :  { %v417_v38 = vmul.f32 %v1666_v18, %v391_v27  ;;  %v443_v27 = vmul.f32 %v1715_v9, %v1527_v20  ;;  %v445_v20 = vmul.f32 %v1735_v15, %v1535_v28  ;;  %v1758_v28 = vrot.slane %v501_v63, %v1508_v35 }
 0x3c6   :  { %v385_v45 = vpop.permute.xlu0 %384 }
 0x3c7   :  { %v387_v51 = vpop.permute.xlu1 %386  ;;  %v390_v53 = vsel %vm388_vm5, %v383_v25, %v385_v45  ;;  %v612_v33 = vpack.c.bf16 %v417_v38, %v377_v34 }
 0x3c8   :  { %v392_v58 = vsel %vm388_vm5, %v387_v51, %v381_v22  ;;  %v389_v60 = vsel %vm388_vm5, %v385_v45, %v387_v51  ;;  %v418_v61 = vmul.f32 %v1685_v32, %v390_v53  ;;  %v446_v51 = vmul.f32 %v1726_v12, %v1537_v29 }
 0x3c9   :  { %v416_v48 = vmul.f32 %v1682_v31, %v392_v58  ;;  %v419_v1 = vmul.f32 %v1692_v39, %v389_v60  ;;  %640 = vmatprep.subr.bf16.mxu0 %v612_v33 }
 0x3ca   :  { %v448_v2 = vpop.permute.xlu0 %447  ;;  %v613_v3 = vpack.c.bf16 %v418_v61, %v378_v57 }
 0x3cb   :  { %v450_v6 = vpop.permute.xlu1 %449  ;;  %v611_v8 = vpack.c.bf16 %v416_v48, %v376_v44  ;;  %v614_v49 = vpack.c.bf16 %v419_v1, %v379_v0  ;;  %v541_v44 = vld [vmem:[#allocation5 + $0x7] ss:$8 sm:$0xf]  ;;  %v1761_v0 = vrot.slane %v501_v63, %v1618_v46 }
 0x3cc   :  { %v458_v52 = vsel %vm455_vm6, %v448_v2, %v450_v6  ;;  %v1764_v1 = vrot.slane %v541_v44, %v1508_v35 }
 0x3cd   :  { %641 = vmatpush1.bf16.msra.mxu0 %v611_v8  ;;  %681 = vmatprep.subr.bf16.mxu1 %v614_v49  ;;  %v483_v19 = vmul.f32 %v1712_v7, %v458_v52  ;;  %v1774_v8 = vrot.slane %v541_v44, %v1511_v36  ;;  %v1777_v49 = vrot.slane %v501_v63, %v1607_v40 }
 0x3ce   :  { %682 = vmatpush1.bf16.msra.mxu1 %v613_v3  ;;  %v452_v16 = vpop.permute.xlu0 %451  ;;  %v1769_v3 = vrot.slane %v501_v63, %v1511_v36 }
 0x3cf   :  { %v454_v22 = vpop.permute.xlu1 %453  ;;  %v457_v25 = vsel %vm455_vm6, %v450_v6, %v452_v16  ;;  %v615_v60 = vpack.c.bf16 %v483_v19, %v443_v27  ;;  %v1785_v19 = vrot.slane %v541_v44, %v1607_v40 }
 0x3d0   :  { %v459_v34 = vsel %vm455_vm6, %v454_v22, %v448_v2  ;;  %v456_v37 = vsel %vm455_vm6, %v452_v16, %v454_v22  ;;  %v484_v38 = vmul.f32 %v1720_v10, %v457_v25  ;;  %v1782_v16 = vrot.slane %v541_v44, %v1618_v46 }
 0x3d1   :  { %v486_v43 = vmul.f32 %v1729_v13, %v459_v34  ;;  %v485_v45 = vmul.f32 %v1732_v14, %v456_v37 }
 0x3d2   :  { %v488_v53 = vpop.permute.xlu0 %487  ;;  %v616_v33 = vpack.c.bf16 %v484_v38, %v444_v4 }
 0x3d3   :  { %v490_v57 = vpop.permute.xlu1 %489  ;;  %v618_v58 = vpack.c.bf16 %v486_v43, %v446_v51  ;;  %v617_v61 = vpack.c.bf16 %v485_v45, %v445_v20 }
 0x3d4   :  { %642 = vmatprep.subr.bf16.mxu0 %v616_v33  ;;  %v498_v2 = vsel %vm495_vm7, %v488_v53, %v490_v57 }
 0x3d5   :  { %683 = vmatprep.subr.bf16.mxu1 %v618_v58  ;;  %643 = vmatpush1.bf16.msra.mxu0 %v615_v60  ;;  %v523_v34 = vmul.f32 %v1758_v28, %v498_v2 }
 0x3d6   :  { %684 = vmatpush1.bf16.msra.mxu1 %v617_v61  ;;  %v492_v21 = vpop.permute.xlu0 %491 }
 0x3d7   :  { %v494_v62 = vpop.permute.xlu1 %493  ;;  %v497_v52 = vsel %vm495_vm7, %v490_v57, %v492_v21 }
 0x3d8   :  { %v499_v22 = vsel %vm495_vm7, %v494_v62, %v488_v53  ;;  %v496_v25 = vsel %vm495_vm7, %v492_v21, %v494_v62  ;;  %v524_v43 = vmul.f32 %v1769_v3, %v497_v52  ;;  %v581_v53 = vld [vmem:[#allocation5 + $0x20] ss:$8 sm:$0xf] }
 0x3d9   :  { %v526_v33 = vmul.f32 %v1761_v0, %v499_v22  ;;  %v525_v57 = vmul.f32 %v1777_v49, %v496_v25  ;;  %v1807_v63 = vrot.slane %v581_v53, %v1508_v35  ;;  %v1815_v52 = vrot.slane %v581_v53, %v1618_v46 }
 0x3da   :  { %v528_v29 = vpop.permute.xlu0 %527  ;;  %v1818_v22 = vrot.slane %v581_v53, %v1607_v40 }
 0x3db   :  { %v530_v48 = vpop.permute.xlu1 %529  ;;  %2161 = vst [vmem:[#allocation11_spill] sm:$0xff] %v1815_v52 }
 0x3dc   :  { %v538_v6 = vsel %vm535_vm8, %v528_v29, %v530_v48  ;;  %2162 = vst [vmem:[#allocation12_spill] sm:$0xff] %v1818_v22 }
 0x3dd   :  { %v563_v37 = vmul.f32 %v1764_v1, %v538_v6  ;;  %v1812_v6 = vrot.slane %v581_v53, %v1511_v36 }
 0x3de   :  { %v532_v27 = vpop.permute.xlu0 %531 }
 0x3df   :  { %v534_v38 = vpop.permute.xlu1 %533  ;;  %v537_v4 = vsel %vm535_vm8, %v530_v48, %v532_v27 }
 0x3e0   :  { %v539_v45 = vsel %vm535_vm8, %v534_v38, %v528_v29  ;;  %v536_v51 = vsel %vm535_vm8, %v532_v27, %v534_v38  ;;  %v564_v20 = vmul.f32 %v1774_v8, %v537_v4  ;;  %v619_v29 = vpack.c.bf16 %v563_v37, %v523_v34 }
 0x3e1   :  { %v566_v58 = vmul.f32 %v1782_v16, %v539_v45  ;;  %v565_v60 = vmul.f32 %v1785_v19, %v536_v51  ;;  %v2157_v45 = vmov 0.0  }
 0x3e2   :  { %v568_v61 = vpop.permute.xlu0 %567  ;;  %v620_v21 = vpack.c.bf16 %v564_v20, %v524_v43 }
 0x3e3   :  { %v570_v62 = vpop.permute.xlu1 %569  ;;  %v622_v44 = vpack.c.bf16 %v566_v58, %v526_v33  ;;  %v621_v48 = vpack.c.bf16 %v565_v60, %v525_v57  ;;  %v627_v57 = vld [vmem:[%s2150_s4] sm:$0xf] }
 0x3e4   :  { %v578_v2 = vsel %vm575_vm9, %v568_v61, %v570_v62  ;;  %644 = vmatprep.subr.bf16.mxu0 %v620_v21 }
 0x3e5   :  { %685 = vmatprep.subr.bf16.mxu1 %v622_v44  ;;  %645 = vmatpush1.bf16.msra.mxu0 %v619_v29  ;;  %v603_v27 = vmul.f32 %v1807_v63, %v578_v2 }
 0x3e6   :  { %686 = vmatpush1.bf16.msra.mxu1 %v621_v48  ;;  %v572_v25 = vpop.permute.xlu0 %571 }
 0x3e7   :  { %v574_v34 = vpop.permute.xlu1 %573  ;;  %v577_v37 = vsel %vm575_vm9, %v570_v62, %v572_v25  ;;  %v623_v53 = vpack.c.bf16 %v2157_v45, %v603_v27 }
 0x3e8   :  { %v579_v38 = vsel %vm575_vm9, %v574_v34, %v568_v61  ;;  %v576_v4 = vsel %vm575_vm9, %v572_v25, %v574_v34  ;;  %v604_v46 = vmul.f32 %v1812_v6, %v577_v37 }
 0x3e9   :  { %v606_v43 = vmul.f32 %v1815_v52, %v579_v38  ;;  %v605_v40 = vmul.f32 %v1818_v22, %v576_v4 }
 0x3ea   :  { %v624_v51 = vpack.c.bf16 %v2157_v45, %v604_v46 }
 0x3eb   :  { %v626_v20 = vpack.c.bf16 %v2157_v45, %v606_v43  ;;  %v625_v33 = vpack.c.bf16 %v2157_v45, %v605_v40 }
 0x3ec   :  { %646 = vmatprep.subr.bf16.mxu0 %v624_v51 }
 0x3ed   :  { %687 = vmatprep.subr.bf16.mxu1 %v626_v20  ;;  %647 = vmatpush1.bf16.msra.mxu0 %v623_v53 }
 0x3ee   :  { %688 = vmatpush1.bf16.msra.mxu1 %v625_v33 }
 0x3f0   :  { %1178 = vmatmul.mubr.msk.bf16.vlgmr.msra.gmra.mrb[0].mxu0 %vm634_vm10, %v627_v57 }
 0x3f1   :  { %1179 = vmatmul.mubr.msk.bf16.vlgmr.msra.gmra.mrb[0].mxu1 %vm634_vm10, %v627_v57  ;;  %1102 = vmatprep.mubr.bf16.mxu0 %v1313_v30 }
 0x3f2   :  { %1143 = vmatprep.mubr.bf16.mxu1 %v1313_v30 }
 0x3f7   :  { %v632_v58 = vpop.permute.xlu0 %631 }
 0x4c3   :  { %v672_v60 = vpop.f32.mrb[0].mxu0 }
 0x4c4   :  { %v713_v61 = vpop.f32.mrb[0].mxu1  ;;  %v673_v21 = vadd.f32 %v672_v60, %v632_v58  ;;  %v674_v62 = vpop.f32.mrb[1].mxu0 }
 0x4c5   :  { %v675_v44 = vadd.f32 %v674_v62, %v632_v58  ;;  %v715_v29 = vpop.f32.mrb[1].mxu1  ;;  %v676_v48 = vpop.f32.mrb[2].mxu0  ;;  %v714_v34 = vadd.f32 %v713_v61, %v632_v58 }
 0x4c6   :  { %v677_v2 = vpop.f32.mrb[3].mxu0  ;;  %v717_v25 = vpop.f32.mrb[2].mxu1  ;;  %720 = vrot.lane.b32.xlu1 %v673_v21, %s1302_s24  ;;  %v716_v37 = vadd.f32 %v715_v29, %v632_v58 }
 0x4c7   :  { %v718_v27 = vpop.f32.mrb[3].mxu1  ;;  %724 = vrot.lane.b32.xlu0 %v675_v44, %s1302_s24 }
 0x4ca   :  { %722 = vrot.lane.b32.xlu1 %v714_v34, %s1302_s24 }
 0x4ce   :  { %726 = vrot.lane.b32.xlu1 %v716_v37, %s1302_s24 }
 0x538   :  { %v721_v30 = vpop.permute.xlu1 %720 }
 0x539   :  { %v725_v38 = vpop.permute.xlu0 %724 }
 0x53a   :  { %v730_v4 = vsel %vm79_vm0, %v725_v38, %v721_v30  ;;  %v728_v43 = vsel %vm79_vm0, %v721_v30, %v725_v38 }
 0x53b   :  { %v732_v46 = vadd.f32 %v730_v4, %v673_v21  ;;  %v733_v51 = vadd.f32 %v728_v43, %v675_v44 }
 0x53c   :  { %v723_v40 = vpop.permute.xlu1 %722 }
 0x53d   :  { %736 = vrot.lane.b32.xlu0 %v732_v46, %s1305_s14 }
 0x540   :  { %v727_v20 = vpop.permute.xlu1 %726 }
 0x541   :  { %v731_v53 = vsel %vm79_vm0, %v727_v20, %v723_v40  ;;  %740 = vrot.lane.b32.xlu0 %v733_v51, %s1305_s14  ;;  %v729_v57 = vsel %vm79_vm0, %v723_v40, %v727_v20 }
 0x542   :  { %v734_v33 = vadd.f32 %v731_v53, %v714_v34  ;;  %v735_v58 = vadd.f32 %v729_v57, %v716_v37 }
 0x544   :  { %738 = vrot.lane.b32.xlu1 %v734_v33, %s1305_s14 }
 0x548   :  { %742 = vrot.lane.b32.xlu1 %v735_v58, %s1305_s14 }
 0x5af   :  { %v737_v60 = vpop.permute.xlu0 %736 }
 0x5b3   :  { %v741_v61 = vpop.permute.xlu0 %740 }
 0x5b4   :  { %v746_v62 = vsel %vm96_vm1, %v741_v61, %v737_v60  ;;  %v744_v48 = vsel %vm96_vm1, %v737_v60, %v741_v61 }
 0x5b5   :  { %v748_v29 = vadd.f32 %v746_v62, %v732_v46  ;;  %v749_v25 = vadd.f32 %v744_v48, %v733_v51 }
 0x5b6   :  { %v739_v2 = vpop.permute.xlu1 %738 }
 0x5b7   :  { %752 = vrot.lane.b32.xlu0 %v748_v29, %s1306_s1 }
 0x5ba   :  { %v743_v27 = vpop.permute.xlu1 %742 }
 0x5bb   :  { %v747_v30 = vsel %vm96_vm1, %v743_v27, %v739_v2  ;;  %756 = vrot.lane.b32.xlu0 %v749_v25, %s1306_s1  ;;  %v745_v4 = vsel %vm96_vm1, %v739_v2, %v743_v27 }
 0x5bc   :  { %v750_v38 = vadd.f32 %v747_v30, %v734_v33  ;;  %v751_v46 = vadd.f32 %v745_v4, %v735_v58 }
 0x5be   :  { %754 = vrot.lane.b32.xlu1 %v750_v38, %s1306_s1 }
 0x5c2   :  { %758 = vrot.lane.b32.xlu1 %v751_v46, %s1306_s1 }
 0x629   :  { %v753_v43 = vpop.permute.xlu0 %752 }
 0x62d   :  { %v757_v40 = vpop.permute.xlu0 %756 }
 0x62e   :  { %v760_v51 = vsel %vm113_vm2, %v753_v43, %v757_v40  ;;  %v762_v20 = vsel %vm113_vm2, %v757_v40, %v753_v43 }
 0x62f   :  { %v764_v53 = vadd.f32 %v762_v20, %v748_v29  ;;  %v765_v57 = vadd.f32 %v760_v51, %v749_v25 }
 0x630   :  { %v755_v60 = vpop.permute.xlu1 %754 }
 0x631   :  { %v768_v33 = vadd.f32 %v765_v57, %v764_v53 }
 0x633   :  { %v770_v61 = vmul.f32 0.0625, %v768_v33 }
 0x634   :  { %v759_v62 = vpop.permute.xlu1 %758 }
 0x635   :  { %v761_v48 = vsel %vm113_vm2, %v755_v60, %v759_v62  ;;  %v763_v58 = vsel %vm113_vm2, %v759_v62, %v755_v60  ;;  %v1877_v2 = vsub.f32 %v673_v21, %v770_v61  ;;  %v1881_v43 = vsub.f32 %v675_v44, %v770_v61 }
 0x636   :  { %v766_v27 = vadd.f32 %v763_v58, %v750_v38  ;;  %v767_v30 = vadd.f32 %v761_v48, %v751_v46 }
 0x637   :  { %v776_v4 = vmul.f32 %v1877_v2, %v1877_v2  ;;  %v777_v40 = vmul.f32 %v1881_v43, %v1881_v43 }
 0x638   :  { %v769_v29 = vadd.f32 %v767_v30, %v766_v27 }
 0x639   :  { %780 = vrot.lane.b32.xlu0 %v776_v4, %s1302_s24 }
 0x63a   :  { %v771_v25 = vmul.f32 0.0625, %v769_v29 }
 0x63c   :  { %v1886_v51 = vsub.f32 %v714_v34, %v771_v25  ;;  %v1891_v38 = vsub.f32 %v716_v37, %v771_v25 }
 0x63d   :  { %784 = vrot.lane.b32.xlu0 %v777_v40, %s1302_s24 }
 0x63e   :  { %v778_v21 = vmul.f32 %v1886_v51, %v1886_v51  ;;  %v779_v44 = vmul.f32 %v1891_v38, %v1891_v38 }
 0x640   :  { %782 = vrot.lane.b32.xlu1 %v778_v21, %s1302_s24 }
 0x644   :  { %786 = vrot.lane.b32.xlu1 %v779_v44, %s1302_s24 }
 0x6ab   :  { %v781_v46 = vpop.permute.xlu0 %780 }
 0x6af   :  { %v785_v20 = vpop.permute.xlu0 %784 }
 0x6b0   :  { %v790_v34 = vsel %vm79_vm0, %v785_v20, %v781_v46  ;;  %v788_v57 = vsel %vm79_vm0, %v781_v46, %v785_v20 }
 0x6b1   :  { %v792_v53 = vadd.f32 %v790_v34, %v776_v4  ;;  %v793_v37 = vadd.f32 %v788_v57, %v777_v40 }
 0x6b2   :  { %v783_v60 = vpop.permute.xlu1 %782 }
 0x6b3   :  { %796 = vrot.lane.b32.xlu0 %v792_v53, %s1305_s14 }
 0x6b6   :  { %v787_v33 = vpop.permute.xlu1 %786 }
 0x6b7   :  { %v791_v61 = vsel %vm79_vm0, %v787_v33, %v783_v60  ;;  %800 = vrot.lane.b32.xlu0 %v793_v37, %s1305_s14  ;;  %v789_v48 = vsel %vm79_vm0, %v783_v60, %v787_v33 }
 0x6b8   :  { %v794_v62 = vadd.f32 %v791_v61, %v778_v21  ;;  %v795_v58 = vadd.f32 %v789_v48, %v779_v44 }
 0x6ba   :  { %798 = vrot.lane.b32.xlu1 %v794_v62, %s1305_s14 }
 0x6be   :  { %802 = vrot.lane.b32.xlu1 %v795_v58, %s1305_s14  ;;  %s1316_s14 = smov [#allocation7]  }
 0x6bf   :  { %s1165_s18 = sshll.u32 %s1316_s14, 4  ;;  %s1166_s18 = int_to_ptr.vmem [resolvable:$true] %s1165_s18 }
 0x6c0   :  { %s1272_s8 = scalar_lea.vmem %s1166_s18, 512  ;;  %p1277_p3 = scmp.lt.s32.totalorder %s1166_s18, %s1166_s18 }
 0x6c1   :  { %p1273_p2 = scmp.ne.s32.totalorder %s1166_s18, %s1272_s8  ;;  %p1278_p4 = scmp.lt.s32.totalorder %s1272_s8, %s1272_s8 }
 0x6c3   :  { %p1279_p5 = por %p1278_p4, %p1277_p3 }
 0x6c5   :  { %p1280_p6 = pnand %p1279_p5, %p1273_p2 }
 0x725   :  { %v797_v27 = vpop.permute.xlu0 %796 }
 0x729   :  { %v801_v30 = vpop.permute.xlu0 %800 }
 0x72a   :  { %v806_v4 = vsel %vm96_vm1, %v801_v30, %v797_v27  ;;  %v804_v25 = vsel %vm96_vm1, %v797_v27, %v801_v30 }
 0x72b   :  { %v808_v29 = vadd.f32 %v806_v4, %v792_v53  ;;  %v809_v21 = vadd.f32 %v804_v25, %v793_v37 }
 0x72c   :  { %v799_v40 = vpop.permute.xlu1 %798 }
 0x72d   :  { %812 = vrot.lane.b32.xlu0 %v808_v29, %s1306_s1 }
 0x730   :  { %v803_v46 = vpop.permute.xlu1 %802 }
 0x731   :  { %v807_v20 = vsel %vm96_vm1, %v803_v46, %v799_v40  ;;  %816 = vrot.lane.b32.xlu0 %v809_v21, %s1306_s1  ;;  %v805_v34 = vsel %vm96_vm1, %v799_v40, %v803_v46 }
 0x732   :  { %v810_v44 = vadd.f32 %v807_v20, %v794_v62  ;;  %v811_v53 = vadd.f32 %v805_v34, %v795_v58 }
 0x734   :  { %814 = vrot.lane.b32.xlu1 %v810_v44, %s1306_s1 }
 0x738   :  { %818 = vrot.lane.b32.xlu1 %v811_v53, %s1306_s1 }
 0x79f   :  { %v813_v57 = vpop.permute.xlu0 %812 }
 0x7a3   :  { %v817_v60 = vpop.permute.xlu0 %816 }
 0x7a4   :  { %v820_v37 = vsel %vm113_vm2, %v813_v57, %v817_v60  ;;  %v822_v33 = vsel %vm113_vm2, %v817_v60, %v813_v57 }
 0x7a5   :  { %v824_v61 = vadd.f32 %v822_v33, %v808_v29  ;;  %v825_v48 = vadd.f32 %v820_v37, %v809_v21  ;;  %v840_v29 = vld [vmem:[%s2152_s6] sm:$0x3] }
 0x7a6   :  { %v815_v27 = vpop.permute.xlu1 %814  ;;  %v856_v21 = vld [vmem:[%s2153_s7] sm:$0x3]  ;;  %v845_v57 = vrot.slane %v840_v29, %v1508_v35  ;;  %v849_v60 = vrot.slane %v840_v29, %v1511_v36 }
 0x7a7   :  { %v828_v62 = vadd.f32 %v825_v48, %v824_v61 }
 0x7a9   :  { %v830_v30 = vmul.f32 0.0625, %v828_v62 }
 0x7aa   :  { %v819_v4 = vpop.permute.xlu1 %818 }
 0x7ab   :  { %v832_v25 = vadd.f32 1e-05, %v830_v30  ;;  %v821_v58 = vsel %vm113_vm2, %v815_v27, %v819_v4  ;;  %v823_v40 = vsel %vm113_vm2, %v819_v4, %v815_v27 }
 0x7ac   :  { %v826_v46 = vadd.f32 %v823_v40, %v810_v44  ;;  %v827_v20 = vadd.f32 %v821_v58, %v811_v53  ;;  %v861_v44 = vrot.slane %v856_v21, %v1508_v35  ;;  %v865_v53 = vrot.slane %v856_v21, %v1511_v36 }
 0x7ad   :  { %1212 = vrsqrt.f32 %v832_v25 }
 0x7ae   :  { %v829_v34 = vadd.f32 %v827_v20, %v826_v46 }
 0x7b0   :  { %v831_v45 = vmul.f32 0.0625, %v829_v34 }
 0x7b2   :  { %v833_v52 = vadd.f32 1e-05, %v831_v45 }
 0x7b4   :  { %1214 = vrsqrt.f32 %v833_v52 }
 0x7b7   :  { %v1213_v37 = vpop.eup %1212 }
 0x7b8   :  { %v836_v45 = vmul.f32 %v1213_v37, %v1877_v2  ;;  %v837_v33 = vmul.f32 %v1213_v37, %v1881_v43 }
 0x7ba   :  { %v852_v61 = vmul.f32 %v845_v57, %v836_v45  ;;  %v853_v48 = vmul.f32 %v849_v60, %v837_v33 }
 0x7bc   :  { %v868_v52 = vadd.f32 %v861_v44, %v852_v61  ;;  %v869_v27 = vadd.f32 %v865_v53, %v853_v48 }
 0x7be   :  { %v1215_v62 = vpop.eup %1214  ;;  %v876_v30 = vmul.f32 %v868_v52, %v868_v52  ;;  %v877_v4 = vmul.f32 %v869_v27, %v869_v27 }
 0x7bf   :  { %v838_v25 = vmul.f32 %v1215_v62, %v1886_v51  ;;  %v839_v58 = vmul.f32 %v1215_v62, %v1891_v38 }
 0x7c0   :  { %v880_v40 = vmul.f32 %v876_v30, %v868_v52  ;;  %v881_v46 = vmul.f32 %v877_v4, %v869_v27  ;;  %v872_v4 = vmul.f32 0.5, %v868_v52 }
 0x7c1   :  { %v854_v35 = vmul.f32 %v845_v57, %v838_v25  ;;  %v855_v20 = vmul.f32 %v849_v60, %v839_v58  ;;  %v873_v58 = vmul.f32 0.5, %v869_v27 }
 0x7c2   :  { %v884_v36 = vmul.f32 0.044715, %v880_v40  ;;  %v885_v34 = vmul.f32 0.044715, %v881_v46 }
 0x7c3   :  { %v870_v2 = vadd.f32 %v861_v44, %v854_v35  ;;  %v871_v29 = vadd.f32 %v865_v53, %v855_v20 }
 0x7c4   :  { %v888_v43 = vadd.f32 %v884_v36, %v868_v52  ;;  %v889_v21 = vadd.f32 %v885_v34, %v869_v27 }
 0x7c5   :  { %v878_v37 = vmul.f32 %v870_v2, %v870_v2  ;;  %v879_v45 = vmul.f32 %v871_v29, %v871_v29  ;;  %v874_v36 = vmul.f32 0.5, %v870_v2 }
 0x7c6   :  { %v892_v33 = vmul.f32 0.7978846, %v888_v43  ;;  %v893_v61 = vmul.f32 0.7978846, %v889_v21  ;;  %v875_v43 = vmul.f32 0.5, %v871_v29 }
 0x7c7   :  { %v882_v48 = vmul.f32 %v878_v37, %v870_v2  ;;  %v883_v22 = vmul.f32 %v879_v45, %v871_v29 }
 0x7c8   :  { %1216 = vtanh.f32 %v892_v33 }
 0x7c9   :  { %1218 = vtanh.f32 %v893_v61  ;;  %v886_v51 = vmul.f32 0.044715, %v882_v48  ;;  %v887_v38 = vmul.f32 0.044715, %v883_v22 }
 0x7cb   :  { %v890_v62 = vadd.f32 %v886_v51, %v870_v2  ;;  %v891_v30 = vadd.f32 %v887_v38, %v871_v29  ;;  %v1061_v2 = vld [vmem:[%s2155_s9] sm:$0xff] }
 0x7cd   :  { %v894_v57 = vmul.f32 0.7978846, %v890_v62  ;;  %v895_v60 = vmul.f32 0.7978846, %v891_v30 }
 0x7cf   :  { %1220 = vtanh.f32 %v894_v57 }
 0x7d0   :  { %1222 = vtanh.f32 %v895_v60 }
 0x7d2   :  { %v1217_v44 = vpop.eup %1216 }
 0x7d3   :  { %v1219_v53 = vpop.eup %1218  ;;  %v900_v25 = vadd.f32 1.0, %v1217_v44 }
 0x7d4   :  { %v901_v40 = vadd.f32 1.0, %v1219_v53 }
 0x7d5   :  { %v1943_v46 = vmul.f32 %v900_v25, %v872_v4 }
 0x7d6   :  { %v1945_v35 = vmul.f32 %v901_v40, %v873_v58 }
 0x7d7   :  { %908 = vrot.lane.b32.xlu0 %v1943_v46, %s1307_s2 }
 0x7d8   :  { %910 = vrot.lane.b32.xlu1 %v1945_v35, %s1307_s2 }
 0x7d9   :  { %v1221_v22 = vpop.eup %1220 }
 0x7da   :  { %v1223_v20 = vpop.eup %1222  ;;  %v902_v34 = vadd.f32 1.0, %v1221_v22 }
 0x7db   :  { %v903_v21 = vadd.f32 1.0, %v1223_v20 }
 0x7dc   :  { %v1951_v52 = vmul.f32 %v902_v34, %v874_v36 }
 0x7dd   :  { %v1953_v27 = vmul.f32 %v903_v21, %v875_v43 }
 0x7de   :  { %912 = vrot.lane.b32.xlu0 %v1951_v52, %s1307_s2 }
 0x7df   :  { %914 = vrot.lane.b32.xlu1 %v1953_v27, %s1307_s2 }
 0x7e2   :  { %924 = vrot.lane.b32.xlu0 %v1943_v46, %s1302_s24 }
 0x7e3   :  { %926 = vrot.lane.b32.xlu1 %v1945_v35, %s1302_s24 }
 0x7e6   :  { %928 = vrot.lane.b32.xlu0 %v1951_v52, %s1302_s24 }
 0x7e7   :  { %930 = vrot.lane.b32.xlu1 %v1953_v27, %s1302_s24 }
 0x7ea   :  { %940 = vrot.lane.b32.xlu0 %v1943_v46, %s1308_s3 }
 0x7eb   :  { %942 = vrot.lane.b32.xlu1 %v1945_v35, %s1308_s3 }
 0x7ee   :  { %944 = vrot.lane.b32.xlu0 %v1951_v52, %s1308_s3 }
 0x7ef   :  { %946 = vrot.lane.b32.xlu1 %v1953_v27, %s1308_s3 }
 0x7f2   :  { %956 = vrot.lane.b32.xlu0 %v1943_v46, %s1309_s26 }
 0x7f3   :  { %958 = vrot.lane.b32.xlu1 %v1945_v35, %s1309_s26 }
 0x7f6   :  { %960 = vrot.lane.b32.xlu0 %v1951_v52, %s1309_s26 }
 0x7f7   :  { %962 = vrot.lane.b32.xlu1 %v1953_v27, %s1309_s26 }
 0x7fa   :  { %976 = vrot.lane.b32.xlu0 %v1943_v46, %s1310_s27 }
 0x7fb   :  { %978 = vrot.lane.b32.xlu1 %v1945_v35, %s1310_s27 }
 0x7fe   :  { %980 = vrot.lane.b32.xlu0 %v1951_v52, %s1310_s27 }
 0x7ff   :  { %982 = vrot.lane.b32.xlu1 %v1953_v27, %s1310_s27 }
 0x802   :  { %992 = vrot.lane.b32.xlu0 %v1943_v46, %s1311_s28 }
 0x803   :  { %994 = vrot.lane.b32.xlu1 %v1945_v35, %s1311_s28 }
 0x806   :  { %996 = vrot.lane.b32.xlu0 %v1951_v52, %s1311_s28 }
 0x807   :  { %998 = vrot.lane.b32.xlu1 %v1953_v27, %s1311_s28 }
 0x80a   :  { %1008 = vrot.lane.b32.xlu0 %v1943_v46, %s1312_s29 }
 0x80b   :  { %1010 = vrot.lane.b32.xlu1 %v1945_v35, %s1312_s29 }
 0x80e   :  { %1012 = vrot.lane.b32.xlu0 %v1951_v52, %s1312_s29 }
 0x80f   :  { %1014 = vrot.lane.b32.xlu1 %v1953_v27, %s1312_s29 }
 0x812   :  { %1024 = vrot.lane.b32.xlu0 %v1943_v46, %s1314_s30 }
 0x813   :  { %1026 = vrot.lane.b32.xlu1 %v1945_v35, %s1314_s30 }
 0x816   :  { %1028 = vrot.lane.b32.xlu0 %v1951_v52, %s1314_s30 }
 0x817   :  { %1030 = vrot.lane.b32.xlu1 %v1953_v27, %s1314_s30 }
 0x81a   :  { %1064 = vperm.xlu0 %1199, %v1061_v2  }
 0x849   :  { %v909_v29 = vpop.permute.xlu0 %908 }
 0x84a   :  { %v911_v37 = vpop.permute.xlu1 %910 }
 0x84b   :  { %v918_v61 = vsel %vm270_vm3, %v909_v29, %v911_v37 }
 0x84c   :  { %v921_v62 = vmul.f32 %v918_v61, %v1610_v41 }
 0x850   :  { %v913_v45 = vpop.permute.xlu0 %912 }
 0x851   :  { %v915_v33 = vpop.permute.xlu1 %914  ;;  %v917_v30 = vsel %vm270_vm3, %v911_v37, %v913_v45 }
 0x852   :  { %v916_v60 = vsel %vm270_vm3, %v913_v45, %v915_v33  ;;  %v919_v44 = vsel %vm270_vm3, %v915_v33, %v909_v29  ;;  %v922_v40 = vmul.f32 %v917_v30, %v1624_v50 }
 0x853   :  { %v920_v20 = vmul.f32 %v919_v44, %v1621_v47  ;;  %v923_v36 = vmul.f32 %v916_v60, %v1635_v56 }
 0x854   :  { %v925_v48 = vpop.permute.xlu0 %924 }
 0x855   :  { %v927_v51 = vpop.permute.xlu1 %926 }
 0x856   :  { %v934_v38 = vsel %vm79_vm0, %v925_v48, %v927_v51 }
 0x857   :  { %v937_v57 = vmul.f32 %v934_v38, %v1613_v42 }
 0x858   :  { %v929_v53 = vpop.permute.xlu0 %928 }
 0x859   :  { %v933_v4 = vsel %vm79_vm0, %v927_v51, %v929_v53  ;;  %v931_v25 = vpop.permute.xlu1 %930  ;;  %v1041_v58 = vpack.c.bf16 %v937_v57, %v921_v62 }
 0x85a   :  { %v938_v41 = vmul.f32 %v933_v4, %v1632_v55  ;;  %v932_v22 = vsel %vm79_vm0, %v929_v53, %v931_v25  ;;  %v935_v42 = vsel %vm79_vm0, %v931_v25, %v925_v48 }
 0x85b   :  { %v936_v34 = vmul.f32 %v935_v42, %v1629_v54  ;;  %v939_v43 = vmul.f32 %v932_v22, %v1642_v59  ;;  %1070 = vmatprep.subr.bf16.mxu0 %v1041_v58 }
 0x85c   :  { %v1042_v21 = vpack.c.bf16 %v938_v41, %v922_v40  ;;  %v941_v2 = vpop.permute.xlu0 %940 }
 0x85d   :  { %v1040_v50 = vpack.c.bf16 %v936_v34, %v920_v20  ;;  %v943_v29 = vpop.permute.xlu1 %942  ;;  %v1043_v55 = vpack.c.bf16 %v939_v43, %v923_v36 }
 0x85e   :  { %v950_v47 = vsel %vm348_vm4, %v941_v2, %v943_v29 }
 0x85f   :  { %1071 = vmatpush1.bf16.msra.mxu0 %v1040_v50  ;;  %1111 = vmatprep.subr.bf16.mxu1 %v1043_v55  ;;  %v953_v59 = vmul.f32 %v950_v47, %v1662_v17  ;;  %v975_v50 = vmul.f32 %v1953_v27, %v1726_v12 }
 0x860   :  { %1112 = vmatpush1.bf16.msra.mxu1 %v1042_v21  ;;  %v945_v37 = vpop.permute.xlu0 %944 }
 0x861   :  { %v947_v45 = vpop.permute.xlu1 %946  ;;  %v949_v61 = vsel %vm348_vm4, %v943_v29, %v945_v37 }
 0x862   :  { %v948_v51 = vsel %vm348_vm4, %v945_v37, %v947_v45  ;;  %v951_v38 = vsel %vm348_vm4, %v947_v45, %v941_v2  ;;  %v954_v44 = vmul.f32 %v949_v61, %v1674_v24  ;;  %v973_v2 = vmul.f32 %v1945_v35, %v1723_v11 }
 0x863   :  { %v952_v4 = vmul.f32 %v951_v38, %v1671_v23  ;;  %v955_v25 = vmul.f32 %v948_v51, %v1677_v26  ;;  %v972_v23 = vmul.f32 %v1943_v46, %v1715_v9  ;;  %v974_v9 = vmul.f32 %v1951_v52, %v1735_v15 }
 0x864   :  { %v957_v33 = vpop.permute.xlu0 %956 }
 0x865   :  { %v959_v56 = vpop.permute.xlu1 %958 }
 0x866   :  { %v966_v54 = vsel %vm388_vm5, %v957_v33, %v959_v56 }
 0x867   :  { %v969_v48 = vmul.f32 %v966_v54, %v1666_v18 }
 0x868   :  { %v961_v62 = vpop.permute.xlu0 %960 }
 0x869   :  { %v965_v30 = vsel %vm388_vm5, %v959_v56, %v961_v62  ;;  %v963_v57 = vpop.permute.xlu1 %962  ;;  %v1045_v60 = vpack.c.bf16 %v969_v48, %v953_v59 }
 0x86a   :  { %v970_v17 = vmul.f32 %v965_v30, %v1685_v32  ;;  %v964_v53 = vsel %vm388_vm5, %v961_v62, %v963_v57  ;;  %v967_v18 = vsel %vm388_vm5, %v963_v57, %v957_v33 }
 0x86b   :  { %v968_v58 = vmul.f32 %v967_v18, %v1682_v31  ;;  %v971_v40 = vmul.f32 %v964_v53, %v1692_v39  ;;  %1072 = vmatprep.subr.bf16.mxu0 %v1045_v60 }
 0x86c   :  { %v1046_v41 = vpack.c.bf16 %v970_v17, %v954_v44  ;;  %v977_v22 = vpop.permute.xlu0 %976 }
 0x86d   :  { %v1044_v24 = vpack.c.bf16 %v968_v58, %v952_v4  ;;  %v979_v42 = vpop.permute.xlu1 %978  ;;  %v1047_v32 = vpack.c.bf16 %v971_v40, %v955_v25 }
 0x86e   :  { %v986_v20 = vsel %vm455_vm6, %v977_v22, %v979_v42 }
 0x86f   :  { %1073 = vmatpush1.bf16.msra.mxu0 %v1044_v24  ;;  %1113 = vmatprep.subr.bf16.mxu1 %v1047_v32  ;;  %v988_v26 = vmul.f32 %v986_v20, %v1712_v7  ;;  %v2164_v24 = vld [vmem:[#allocation11_spill] sm:$0xff]  ;;  %v2165_v32 = vmov 0.0  }
 0x870   :  { %1114 = vmatpush1.bf16.msra.mxu1 %v1046_v41  ;;  %v981_v36 = vpop.permute.xlu0 %980  ;;  %v2163_v41 = vld [vmem:[#allocation12_spill] sm:$0xff] }
 0x871   :  { %v985_v31 = vsel %vm455_vm6, %v979_v42, %v981_v36  ;;  %v983_v39 = vpop.permute.xlu1 %982  ;;  %v1048_v55 = vpack.c.bf16 %v988_v26, %v972_v23 }
 0x872   :  { %v989_v34 = vmul.f32 %v985_v31, %v1720_v10  ;;  %v984_v43 = vsel %vm455_vm6, %v981_v36, %v983_v39  ;;  %v987_v21 = vsel %vm455_vm6, %v983_v39, %v977_v22 }
 0x873   :  { %v990_v7 = vmul.f32 %v984_v43, %v1732_v14  ;;  %v991_v46 = vmul.f32 %v987_v21, %v1729_v13 }
 0x874   :  { %v993_v10 = vpop.permute.xlu0 %992  ;;  %v1049_v29 = vpack.c.bf16 %v989_v34, %v973_v2 }
 0x875   :  { %v1050_v37 = vpack.c.bf16 %v990_v7, %v974_v9  ;;  %v995_v45 = vpop.permute.xlu1 %994  ;;  %v1051_v47 = vpack.c.bf16 %v991_v46, %v975_v50  ;;  %v1224_v7 = vld [vmem:[#allocation2] sm:$0xff] }
 0x876   :  { %1074 = vmatprep.subr.bf16.mxu0 %v1049_v29  ;;  %v1002_v13 = vsel %vm495_vm7, %v993_v10, %v995_v45 }
 0x877   :  { %1115 = vmatprep.subr.bf16.mxu1 %v1051_v47  ;;  %1075 = vmatpush1.bf16.msra.mxu0 %v1048_v55  ;;  %v1004_v54 = vmul.f32 %v1002_v13, %v1758_v28  ;;  %v1225_v55 = vld [vmem:[#allocation2 + $0x10] sm:$0xff] }
 0x878   :  { %1116 = vmatpush1.bf16.msra.mxu1 %v1050_v37  ;;  %v997_v11 = vpop.permute.xlu0 %996 }
 0x879   :  { %v999_v35 = vpop.permute.xlu1 %998  ;;  %v1001_v14 = vsel %vm495_vm7, %v995_v45, %v997_v11  ;;  %v1226_v45 = vld [vmem:[#allocation2 + $0x8] sm:$0xff] }
 0x87a   :  { %v1000_v27 = vsel %vm495_vm7, %v997_v11, %v999_v35  ;;  %v1003_v33 = vsel %vm495_vm7, %v999_v35, %v993_v10  ;;  %v1005_v51 = vmul.f32 %v1001_v14, %v1769_v3  ;;  %v1227_v35 = vld [vmem:[#allocation2 + $0x18] sm:$0xff] }
 0x87b   :  { %v1006_v57 = vmul.f32 %v1000_v27, %v1777_v49  ;;  %v1007_v28 = vmul.f32 %v1003_v33, %v1761_v0 }
 0x87c   :  { %v1009_v15 = vpop.permute.xlu0 %1008 }
 0x87d   :  { %v1011_v52 = vpop.permute.xlu1 %1010 }
 0x87e   :  { %v1018_v12 = vsel %vm535_vm8, %v1009_v15, %v1011_v52 }
 0x87f   :  { %v1020_v59 = vmul.f32 %v1018_v12, %v1764_v1 }
 0x880   :  { %v1013_v56 = vpop.permute.xlu0 %1012 }
 0x881   :  { %v1017_v61 = vsel %vm535_vm8, %v1011_v52, %v1013_v56  ;;  %v1015_v48 = vpop.permute.xlu1 %1014  ;;  %v1052_v53 = vpack.c.bf16 %v1020_v59, %v1004_v54 }
 0x882   :  { %v1021_v38 = vmul.f32 %v1017_v61, %v1774_v8  ;;  %v1016_v62 = vsel %vm535_vm8, %v1013_v56, %v1015_v48  ;;  %v1019_v30 = vsel %vm535_vm8, %v1015_v48, %v1009_v15 }
 0x883   :  { %v1022_v1 = vmul.f32 %v1016_v62, %v1785_v19  ;;  %v1023_v60 = vmul.f32 %v1019_v30, %v1782_v16 }
 0x884   :  { %v1025_v44 = vpop.permute.xlu0 %1024  ;;  %v1053_v17 = vpack.c.bf16 %v1021_v38, %v1005_v51 }
 0x885   :  { %v1054_v3 = vpack.c.bf16 %v1022_v1, %v1006_v57  ;;  %v1027_v18 = vpop.permute.xlu1 %1026  ;;  %v1055_v8 = vpack.c.bf16 %v1023_v60, %v1007_v28 }
 0x886   :  { %v1034_v4 = vsel %vm575_vm9, %v1025_v44, %v1027_v18  ;;  %1076 = vmatprep.subr.bf16.mxu0 %v1053_v17 }
 0x887   :  { %1117 = vmatprep.subr.bf16.mxu1 %v1055_v8  ;;  %1077 = vmatpush1.bf16.msra.mxu0 %v1052_v53  ;;  %v1036_v0 = vmul.f32 %v1034_v4, %v1807_v63 }
 0x888   :  { %1118 = vmatpush1.bf16.msra.mxu1 %v1054_v3  ;;  %v1029_v49 = vpop.permute.xlu0 %1028 }
 0x889   :  { %v1033_v19 = vsel %vm575_vm9, %v1027_v18, %v1029_v49  ;;  %v1031_v16 = vpop.permute.xlu1 %1030  ;;  %v1056_v63 = vpack.c.bf16 %v2165_v32, %v1036_v0 }
 0x88a   :  { %v1037_v25 = vmul.f32 %v1033_v19, %v1812_v6  ;;  %v1032_v58 = vsel %vm575_vm9, %v1029_v49, %v1031_v16  ;;  %v1035_v40 = vsel %vm575_vm9, %v1031_v16, %v1025_v44 }
 0x88b   :  { %v1038_v22 = vmul.f32 %v1032_v58, %v2163_v41  ;;  %v1039_v42 = vmul.f32 %v1035_v40, %v2164_v24 }
 0x88c   :  { %v1057_v20 = vpack.c.bf16 %v2165_v32, %v1037_v25 }
 0x88d   :  { %v1058_v36 = vpack.c.bf16 %v2165_v32, %v1038_v22  ;;  %v1059_v23 = vpack.c.bf16 %v2165_v32, %v1039_v42 }
 0x88e   :  { %1078 = vmatprep.subr.bf16.mxu0 %v1057_v20 }
 0x88f   :  { %1119 = vmatprep.subr.bf16.mxu1 %v1059_v23  ;;  %1079 = vmatpush1.bf16.msra.mxu0 %v1056_v63 }
 0x890   :  { %1120 = vmatpush1.bf16.msra.mxu1 %v1058_v36 }
 0x892   :  { %1180 = vmatmul.mubr.msk.bf16.vlgmr.msra.gmra.mrb[4].mxu0 %vm634_vm10, %v1060_v5 }
 0x893   :  { %1181 = vmatmul.mubr.msk.bf16.vlgmr.msra.gmra.mrb[4].mxu1 %vm634_vm10, %v1060_v5 }
 0x899   :  { %v1065_v6 = vpop.permute.xlu0 %1064 }
 0x965   :  { %v1104_v26 = vpop.f32.mrb[4].mxu0 }
 0x966   :  { %v1105_v31 = vadd.f32 %v1104_v26, %v1065_v6  ;;  %v1145_v39 = vpop.f32.mrb[4].mxu1  ;;  %v1106_v34 = vpop.f32.mrb[5].mxu0 }
 0x967   :  { %v1146_v43 = vadd.f32 %v1145_v39, %v1065_v6  ;;  %v1107_v21 = vadd.f32 %v1106_v34, %v1065_v6  ;;  %v1147_v2 = vpop.f32.mrb[5].mxu1  ;;  %v1108_v9 = vpop.f32.mrb[6].mxu0 }
 0x968   :  { %v1152_v46 = vadd.f32 %v1224_v7, %v1105_v31  ;;  %v1148_v50 = vadd.f32 %v1147_v2, %v1065_v6  ;;  %v1149_v10 = vpop.f32.mrb[6].mxu1  ;;  %v1109_v29 = vpop.f32.mrb[7].mxu0 }
 0x969   :  { %v1154_v37 = vadd.f32 %v1225_v55, %v1146_v43  ;;  %v1153_v47 = vadd.f32 %v1226_v45, %v1107_v21  ;;  %v1150_v11 = vpop.f32.mrb[7].mxu1 }
 0x96a   :  { %1156 = vst [vmem:[#allocation7] sm:$0xff] %v1152_v46  ;;  %v1155_v15 = vadd.f32 %v1227_v35, %v1148_v50 }
 0x96b   :  { %1158 = vst [vmem:[#allocation7 + $0x10] sm:$0xff] %v1154_v37  ;;  %1157 = vst [vmem:[#allocation7 + $0x8] sm:$0xff] %v1153_v47 }
 0x96c   :  { %1159 = vst [vmem:[#allocation7 + $0x18] sm:$0xff] %v1155_v15 }
 0x96d   :  { %1283 = shalt.err (!%p1280_p6)
}
 0x96e   :  { %s1284_s20 = scalar_lea.hbm %s2156_s10, 512 }
 0x96f   :  { %p1285_p7 = scmp.ne.s32.totalorder %s2156_s10, %s1284_s20  ;;  %p1288_p8 = scmp.lt.u32.totalorder %s1284_s20, %s2156_s10 }
 0x971   :  { %p1290_p9 = pnand %p1288_p8, %p1285_p7 }
 0x973   :  { %1293 = shalt.err (!%p1290_p9)
}
 0x974   :  { %1171 = dma.vmem_to_hbm [thread:$0]  %s1166_s18, 512, %s2156_s10, [#allocation4], %s1301_s23, %s1301_s23, %s1302_s24  }
 0x975   :  { %1298 = dma.done.wait [#allocation4], 512  }
 0x976   :  { %1299 = vsyncadd [#allocation4], 4294966784 }
 0x977   :  { %1175 = vsyncpa [#allocation3], 1 }
 0x978   :  { %1176 = vsyncpa [#allocation6], 1 }
 0x979   :  { %1177 = vsyncpa [#allocation4], 1 }

</bundles_post_ra>
